<compile_context>
chip_gen: v5e
topology: v5e:2x2
jax: 0.10.0
libtpu: 0.0.40
codegen_flags: <defaults>
</compile_context>

<pallas_src>
import functools
import math

import jax
import jax.numpy as jnp
from jax.experimental import pallas as pl
from jax.experimental.pallas import tpu as pltpu


# ---------------------------------------------------------------------------
# in-kernel helpers (traced inside the Pallas kernel body)
# ---------------------------------------------------------------------------
def _layernorm(x, g, b, eps=1e-5):
    mu = jnp.mean(x, axis=-1, keepdims=True)
    var = jnp.mean(jnp.square(x - mu), axis=-1, keepdims=True)
    return (x - mu) * jax.lax.rsqrt(var + eps) * g + b


def _mha(q_in_bf, kv_in_bf, bias, wqkv, wo, p, n_head, self_attn):
    """Multi-head attention.  Returns (Bb*Sq, D) f32.

    q_in_bf : (Bb*Sq, D) bf16      kv_in_bf: (Bb*Sk, D) bf16
    bias    : (Bb, Sq, Sk) f32 additive mask (0 keep / -1e9 masked)
    wqkv    : (D, 3D) bf16  [Wq | Wk | Wv]  (1/sqrt(dh) folded into Wq)
    wo      : (D, D) bf16
    p       : (6, D) f32 rows = [bq, bk, bv, bo, ln_gamma, ln_beta]
    """
    D = wo.shape[0]
    Bb, Sq, Sk = bias.shape
    dh = D // n_head

    if self_attn:
        # one fused lane-dense projection for Q, K and V
        qkv = jnp.dot(q_in_bf, wqkv, preferred_element_type=jnp.float32)   # (Bb*Sq, 3D)
        q = qkv[:, :D] + p[0:1]
        k = qkv[:, D:2 * D] + p[1:2]
        v = qkv[:, 2 * D:] + p[2:3]
    else:
        q = jnp.dot(q_in_bf, wqkv[:, :D],
                    preferred_element_type=jnp.float32) + p[0:1]           # (Bb*Sq, D)
        kv = jnp.dot(kv_in_bf, wqkv[:, D:],
                     preferred_element_type=jnp.float32)                   # (Bb*Sk, 2D)
        k = kv[:, :D] + p[1:2]
        v = kv[:, D:] + p[2:3]

    q3 = q.reshape(Bb, Sq, D).astype(jnp.bfloat16)
    k3 = k.reshape(Bb, Sk, D).astype(jnp.bfloat16)
    v3 = v.reshape(Bb, Sk, D).astype(jnp.bfloat16)

    # Per-head score/context matmuls (unrolled at trace time).  The dh-wide
    # contraction is inherent to attention regardless of layout; the head loop
    # only covers these two batched matmuls + softmax.
    ctx_heads = []
    for h in range(n_head):
        sl = slice(h * dh, (h + 1) * dh)
        s = jnp.einsum('bqd,bkd->bqk', q3[:, :, sl], k3[:, :, sl],
                       preferred_element_type=jnp.float32)                 # (Bb,Sq,Sk)
        s = s + bias
        s = s - jnp.max(s, axis=-1, keepdims=True)
        e = jnp.exp(s)
        attn = e * pl.reciprocal(jnp.sum(e, axis=-1, keepdims=True), approx=True)
        ctx_heads.append(jnp.einsum('bqk,bkd->bqd', attn.astype(jnp.bfloat16),
                                    v3[:, :, sl],
                                    preferred_element_type=jnp.float32))   # (Bb,Sq,dh)

    ctx = jnp.concatenate(ctx_heads, axis=-1)                              # (Bb,Sq,D)
    ctx_bf = ctx.reshape(Bb * Sq, D).astype(jnp.bfloat16)
    # single output projection: head reduction happens inside this contraction
    return jnp.dot(ctx_bf, wo, preferred_element_type=jnp.float32) + p[3:4]


# ---------------------------------------------------------------------------
# fused decoder-stack kernel: grid = (batch-block [parallel], layer [arbitrary])
# ---------------------------------------------------------------------------
def fused_decoder_kernel(x_ref, enc_ref, tmask_ref, cmask_ref,
                         wqkv1_ref, wo1_ref, p1_ref,
                         wqkv2_ref, wo2_ref, p2_ref,
                         wf1_ref, bf1_ref, wf2_ref, p3_ref,
                         out_ref, resid_ref, *, n_head):
    Bb, S, D = x_ref.shape
    Se = enc_ref.shape[1]
    l = pl.program_id(1)

    # layer 0: initialize the resident f32 residual stream from the embeddings
    @pl.when(l == 0)
    def _init():
        resid_ref[...] = x_ref[...].reshape(Bb * S, D)

    x = resid_ref[...]                                       # (Bb*S, D) f32
    enc_bf = enc_ref[...].reshape(Bb * Se, D)                # (Bb*Se, D) bf16

    # masks -> additive biases (VPU compare+select, hidden under the MXU)
    # TODO(synk): for a pure causal/padding mask these could be generated from
    # iota + scalar-prefetched lengths; kept as inputs to preserve the module's
    # arbitrary-mask API (they are bf16 and resident across the layer axis).
    tbias = jnp.where(tmask_ref[...] > 0, 0.0, -1e9).astype(jnp.float32)   # (Bb,S,S)
    cbias = jnp.where(cmask_ref[...] > 0, 0.0, -1e9).astype(jnp.float32)   # (Bb,S,Se)

    wqkv1 = wqkv1_ref[0]; wo1 = wo1_ref[0]; p1 = p1_ref[0]
    wqkv2 = wqkv2_ref[0]; wo2 = wo2_ref[0]; p2 = p2_ref[0]
    wf1 = wf1_ref[0]; bf1 = bf1_ref[0]; wf2 = wf2_ref[0]; p3 = p3_ref[0]

    # 1) masked multi-head self-attention + residual + layernorm
    x_bf = x.astype(jnp.bfloat16)
    a1 = _mha(x_bf, x_bf, tbias, wqkv1, wo1, p1, n_head, self_attn=True)
    x1 = _layernorm(x + a1, p1[4:5], p1[5:6])

    # 2) cross-attention over encoder output + residual + layernorm
    a2 = _mha(x1.astype(jnp.bfloat16), enc_bf, cbias, wqkv2, wo2, p2,
              n_head, self_attn=False)
    x2 = _layernorm(x1 + a2, p2[4:5], p2[5:6])

    # 3) position-wise FFN + residual + layernorm
    h = jnp.maximum(
        jnp.dot(x2.astype(jnp.bfloat16), wf1,
                preferred_element_type=jnp.float32) + bf1, 0.0)
    ff = jnp.dot(h.astype(jnp.bfloat16), wf2,
                 preferred_element_type=jnp.float32) + p3[0:1]
    x3 = _layernorm(x2 + ff, p3[1:2], p3[2:3])

    resid_ref[...] = x3                                       # carry f32 residual

    @pl.when(l == pl.num_programs(1) - 1)
    def _finalize():
        out_ref[...] = x3.reshape(Bb, S, D).astype(out_ref.dtype)


def _block_bytes(shape, dtype):
    return math.prod(shape) * jnp.dtype(dtype).itemsize


def fused_decoder_layers(x_emb, enc_bf, trg_mask_bf, cross_mask_bf,
                         layer_weights, n_head):
    """x_emb: (B,S,D) f32; enc_bf: (B,Se,D) bf16; masks: (B,S,S)/(B,S,Se) bf16."""
    B, S, D = x_emb.shape
    Se = enc_bf.shape[1]
    L = layer_weights[0].shape[0]
    # Batch blocking: whole batch per grid step so layer weights stream from
    # HBM exactly once per forward.  For very large B*S, pick a divisor of B.
    Bb = B
    nb = B // Bb

    act_specs = [
        pl.BlockSpec((Bb, S, D),  lambda b, l: (b, 0, 0)),
        pl.BlockSpec((Bb, Se, D), lambda b, l: (b, 0, 0)),
        pl.BlockSpec((Bb, S, S),  lambda b, l: (b, 0, 0)),
        pl.BlockSpec((Bb, S, Se), lambda b, l: (b, 0, 0)),
    ]
    w_specs = [pl.BlockSpec((1,) + w.shape[1:], lambda b, l: (l, 0, 0))
               for w in layer_weights]

    # explicit scoped-VMEM budget from the double-buffered block set
    in_blocks = [((Bb, S, D), x_emb.dtype), ((Bb, Se, D), enc_bf.dtype),
                 ((Bb, S, S), trg_mask_bf.dtype), ((Bb, S, Se), cross_mask_bf.dtype)]
    in_blocks += [((1,) + w.shape[1:], w.dtype) for w in layer_weights]
    footprint = 2 * sum(_block_bytes(s, d) for s, d in in_blocks)
    footprint += 2 * _block_bytes((Bb, S, D), jnp.bfloat16)
    footprint += _block_bytes((Bb * S, D), jnp.float32)
    vmem_limit = int(min(max(2 * footprint + (16 << 20), 32 << 20), 64 << 20))

    return pl.pallas_call(
        functools.partial(fused_decoder_kernel, n_head=n_head),
        out_shape=jax.ShapeDtypeStruct((B, S, D), jnp.bfloat16),
        grid_spec=pltpu.PrefetchScalarGridSpec(
            num_scalar_prefetch=0,
            grid=(nb, L),
            in_specs=act_specs + w_specs,
            out_specs=pl.BlockSpec((Bb, S, D), lambda b, l: (b, 0, 0)),
            scratch_shapes=[pltpu.VMEM((Bb * S, D), jnp.float32)],
        ),
        compiler_params=pltpu.CompilerParams(
            dimension_semantics=("parallel", "arbitrary"),
            vmem_limit_bytes=vmem_limit),
    )(x_emb, enc_bf, trg_mask_bf, cross_mask_bf, *layer_weights)


# ---------------------------------------------------------------------------
# final vocab projection: lane-dense, tiled over the (pre-padded) vocab axis
# ---------------------------------------------------------------------------
def vocab_proj_kernel(x_ref, w_ref, b_ref, out_ref):
    out_ref[...] = (jnp.dot(x_ref[...], w_ref[...],
                            preferred_element_type=jnp.float32)
                    + b_ref[...]).astype(out_ref.dtype)


def final_linear(x_bf, w_out_pad, b_out_pad, voc, block_v=512):
    """x_bf: (B,S,D) bf16; w_out_pad: (D, Vp) bf16 pre-padded; b_out_pad: (1, Vp)."""
    B, S, D = x_bf.shape
    Vp = w_out_pad.shape[1]
    block_v = min(block_v, Vp)
    assert Vp % block_v == 0
    M = B * S
    x2 = x_bf.reshape(M, D)

    footprint = 2 * (_block_bytes((M, D), jnp.bfloat16)
                     + _block_bytes((D, block_v), jnp.bfloat16)
                     + _block_bytes((1, block_v), jnp.float32)
                     + _block_bytes((M, block_v), jnp.float32))
    vmem_limit = int(min(max(2 * footprint + (16 << 20), 32 << 20), 64 << 20))

    out = pl.pallas_call(
        vocab_proj_kernel,
        out_shape=jax.ShapeDtypeStruct((M, Vp), jnp.float32),
        grid_spec=pltpu.PrefetchScalarGridSpec(
            num_scalar_prefetch=0,
            grid=(Vp // block_v,),
            in_specs=[
                pl.BlockSpec((M, D), lambda j: (0, 0)),
                pl.BlockSpec((D, block_v), lambda j: (0, j)),
                pl.BlockSpec((1, block_v), lambda j: (0, j)),
            ],
            out_specs=pl.BlockSpec((M, block_v), lambda j: (0, j)),
        ),
        compiler_params=pltpu.CompilerParams(
            dimension_semantics=("parallel",),
            vmem_limit_bytes=vmem_limit),
    )(x2, w_out_pad, b_out_pad)
    return out[:, :voc].reshape(B, S, voc)


# ---------------------------------------------------------------------------
# deterministic parameter construction (stacked over layers, packed, bf16)
# ---------------------------------------------------------------------------
def sinusoidal_pe(max_len, dim):
    pos = jnp.arange(max_len, dtype=jnp.float32)[:, None]
    i = jnp.arange(0, dim, 2, dtype=jnp.float32)
    angle = pos / jnp.power(10000.0, i / dim)
    pe = jnp.zeros((max_len, dim), jnp.float32)
    pe = pe.at[:, 0::2].set(jnp.sin(angle))
    pe = pe.at[:, 1::2].set(jnp.cos(angle))
    return pe


def init_decoder_params(key, vocab, dim, hidden, n_layers, n_head, max_len,
                        block_v=512):
    L = n_layers
    dh = dim // n_head
    scale = 1.0 / math.sqrt(dh)

    def normal(k, shape):
        return 0.02 * jax.random.normal(k, shape, jnp.float32)

    key, k_emb = jax.random.split(key)
    emb_table = normal(k_emb, (vocab, dim))
    pe = sinusoidal_pe(max_len, dim)

    def attn_block(k):
        kq, kk, kv, ko = jax.random.split(k, 4)
        wq = normal(kq, (L, dim, dim)) * scale               # fold 1/sqrt(dh) into Wq
        wk = normal(kk, (L, dim, dim))
        wv = normal(kv, (L, dim, dim))
        wqkv = jnp.concatenate([wq, wk, wv], axis=-1).astype(jnp.bfloat16)  # (L,D,3D)
        wo = normal(ko, (L, dim, dim)).astype(jnp.bfloat16)                 # (L,D,D)
        # packed small params: rows = [bq, bk, bv, bo, ln_gamma, ln_beta]
        p = jnp.concatenate([jnp.zeros((L, 4, dim), jnp.float32),
                             jnp.ones((L, 1, dim), jnp.float32),
                             jnp.zeros((L, 1, dim), jnp.float32)], axis=1)
        return wqkv, wo, p

    key, ka1, ka2, kf1, kf2 = jax.random.split(key, 5)
    wqkv1, wo1, p1 = attn_block(ka1)
    wqkv2, wo2, p2 = attn_block(ka2)

    wf1 = normal(kf1, (L, dim, hidden)).astype(jnp.bfloat16)
    bf1 = jnp.zeros((L, 1, hidden), jnp.float32)
    wf2 = normal(kf2, (L, hidden, dim)).astype(jnp.bfloat16)
    # packed small params: rows = [bf2, ln_gamma, ln_beta]
    p3 = jnp.concatenate([jnp.zeros((L, 1, dim), jnp.float32),
                          jnp.ones((L, 1, dim), jnp.float32),
                          jnp.zeros((L, 1, dim), jnp.float32)], axis=1)

    layer_weights = [wqkv1, wo1, p1, wqkv2, wo2, p2, wf1, bf1, wf2, p3]

    # vocab matrix: pad + cast ONCE here, not inside the jitted forward
    key, k_out = jax.random.split(key)
    w_out = normal(k_out, (dim, vocab))
    Vp = ((vocab + block_v - 1) // block_v) * block_v
    w_out_pad = jnp.pad(w_out, ((0, 0), (0, Vp - vocab))).astype(jnp.bfloat16)
    b_out_pad = jnp.zeros((1, Vp), jnp.float32)
    return emb_table, pe, layer_weights, w_out_pad, b_out_pad


# ---------------------------------------------------------------------------
# full Decoder forward
# ---------------------------------------------------------------------------
def decoder_forward(trg_tokens, enc_src, trg_mask, cross_attn_mask,
                    params, dec_voc_size, n_head):
    emb_table, pe, layer_weights, w_out_pad, b_out_pad = params
    S = trg_tokens.shape[1]
    # TODO(synk): token-embedding gather is data-dependent; kept as plain-JAX glue.
    x = jnp.take(emb_table, trg_tokens, axis=0) + pe[None, :S, :]
    x = fused_decoder_layers(x, enc_src.astype(jnp.bfloat16),
                             trg_mask.astype(jnp.bfloat16),
                             cross_attn_mask.astype(jnp.bfloat16),
                             layer_weights, n_head)
    return final_linear(x, w_out_pad, b_out_pad, dec_voc_size)


if __name__ == "__main__":
    # small, module-consistent shapes
    B, S, Se = 2, 8, 8
    dim, n_head, ffn_hidden_ratio, dec_layers = 32, 4, 4, 2
    dec_voc_size, max_len = 50, 16
    hidden = dim * ffn_hidden_ratio

    key = jax.random.PRNGKey(0)
    key, k_trg, k_enc = jax.random.split(key, 3)

    trg = jax.random.randint(k_trg, (B, S), 0, dec_voc_size, dtype=jnp.int32)
    enc_src = jax.random.normal(k_enc, (B, Se, dim), jnp.float32)

    causal = jnp.tril(jnp.ones((S, S), jnp.float32))
    trg_mask = jnp.broadcast_to(causal, (B, S, S)).astype(jnp.float32)
    cross_attn_mask = jnp.ones((B, S, Se), jnp.float32)

    params = init_decoder_params(key, dec_voc_size, dim, hidden,
                                 dec_layers, n_head, max_len)

    fwd = jax.jit(decoder_forward, static_argnums=(5, 6))
    out = fwd(trg, enc_src, trg_mask, cross_attn_mask, params,
              dec_voc_size, n_head)
    out = jax.block_until_ready(out)

    assert out.shape == (B, S, dec_voc_size), out.shape
    assert bool(jnp.all(jnp.isfinite(out)))
    print("KERNEL_OK")
</pallas_src>

<mosaic_0001>
module attributes {stable_mosaic.version = 11 : i64} {
  func.func @vocab_proj_kernel(%arg0: i32, %arg1: memref<16x32xbf16, #tpu.memory_space<vmem>>, %arg2: memref<32x512xbf16, #tpu.memory_space<vmem>>, %arg3: memref<1x512xf32, #tpu.memory_space<vmem>>, %arg4: memref<16x512xf32, #tpu.memory_space<vmem>>) attributes {dimension_semantics = [#tpu.dimension_semantics<parallel>], iteration_bounds = array<i64: 1>, scalar_prefetch = 0 : i64, scratch_operands = 0 : i64, tpu.core_type = #tpu.core_type<tc>, window_params = [{pipeline_mode = #tpu.pipeline_mode<synchronous>, transform_indices = @transform_0, window_bounds = array<i64: 16, 32>}, {transform_indices = @transform_1, window_bounds = array<i64: 32, 512>}, {transform_indices = @transform_2, window_bounds = array<i64: 1, 512>}, {transform_indices = @transform_3, window_bounds = array<i64: 16, 512>}]} {
    %c0 = arith.constant 0 : index
    %c0_0 = arith.constant 0 : index
    %0 = vector.load %arg1[%c0, %c0_0] : memref<16x32xbf16, #tpu.memory_space<vmem>>, vector<16x32xbf16>
    %c0_1 = arith.constant 0 : index
    %c0_2 = arith.constant 0 : index
    %1 = vector.load %arg2[%c0_1, %c0_2] : memref<32x512xbf16, #tpu.memory_space<vmem>>, vector<32x512xbf16>
    %cst = arith.constant dense<0.000000e+00> : vector<16x512xf32>
    %2 = tpu.matmul %0, %1, %cst {dimension_numbers = #tpu.dot_dimension_numbers<[1], [0], [0], [1], [0, 0, 1, 1], [], []>} : vector<16x32xbf16>, vector<32x512xbf16>, vector<16x512xf32> -> vector<16x512xf32>
    %c0_3 = arith.constant 0 : index
    %c0_4 = arith.constant 0 : index
    %3 = vector.load %arg3[%c0_3, %c0_4] : memref<1x512xf32, #tpu.memory_space<vmem>>, vector<1x512xf32>
    %4 = vector.broadcast %3 : vector<1x512xf32> to vector<16x512xf32>
    %5 = arith.addf %2, %4 : vector<16x512xf32>
    %c0_5 = arith.constant 0 : index
    %c0_6 = arith.constant 0 : index
    %6 = vector.load %arg4[%c0_5, %c0_6] : memref<16x512xf32, #tpu.memory_space<vmem>>, vector<16x512xf32>
    tpu.vector_store %arg4[%c0_5, %c0_6], %5 {strides = array<i32>} : memref<16x512xf32, #tpu.memory_space<vmem>>, vector<16x512xf32>,
    return
  }
  func.func @transform_0(%arg0: i32) -> (i32, i32) {
    %c0_i32 = arith.constant 0 : i32
    %c0_i32_0 = arith.constant 0 : i32
    %c0_i32_1 = arith.constant 0 : i32
    return %c0_i32, %c0_i32_0 : i32, i32
  }
  func.func @transform_1(%arg0: i32) -> (i32, i32) {
    %c0_i32 = arith.constant 0 : i32
    %c0_i32_0 = arith.constant 0 : i32
    return %c0_i32, %arg0 : i32, i32
  }
  func.func @transform_2(%arg0: i32) -> (i32, i32) {
    %c0_i32 = arith.constant 0 : i32
    %c0_i32_0 = arith.constant 0 : i32
    return %c0_i32, %arg0 : i32, i32
  }
  func.func @transform_3(%arg0: i32) -> (i32, i32) {
    %c0_i32 = arith.constant 0 : i32
    %c0_i32_0 = arith.constant 0 : i32
    return %c0_i32, %arg0 : i32, i32
  }
}

module attributes {stable_mosaic.version = 11 : i64} {
  func.func @fused_decoder_kernel(%arg0: i32, %arg1: i32, %arg2: memref<2x8x32xf32, #tpu.memory_space<vmem>>, %arg3: memref<2x8x32xbf16, #tpu.memory_space<vmem>>, %arg4: memref<2x8x8xbf16, #tpu.memory_space<vmem>>, %arg5: memref<2x8x8xbf16, #tpu.memory_space<vmem>>, %arg6: memref<1x32x96xbf16, #tpu.memory_space<vmem>>, %arg7: memref<1x32x32xbf16, #tpu.memory_space<vmem>>, %arg8: memref<1x6x32xf32, #tpu.memory_space<vmem>>, %arg9: memref<1x32x96xbf16, #tpu.memory_space<vmem>>, %arg10: memref<1x32x32xbf16, #tpu.memory_space<vmem>>, %arg11: memref<1x6x32xf32, #tpu.memory_space<vmem>>, %arg12: memref<1x32x128xbf16, #tpu.memory_space<vmem>>, %arg13: memref<1x1x128xf32, #tpu.memory_space<vmem>>, %arg14: memref<1x128x32xbf16, #tpu.memory_space<vmem>>, %arg15: memref<1x3x32xf32, #tpu.memory_space<vmem>>, %arg16: memref<2x8x32xbf16, #tpu.memory_space<vmem>>, %arg17: memref<16x32xf32, #tpu.memory_space<vmem>>) attributes {dimension_semantics = [#tpu.dimension_semantics<parallel>, #tpu.dimension_semantics<arbitrary>], iteration_bounds = array<i64: 1, 2>, scalar_prefetch = 0 : i64, scratch_operands = 1 : i64, tpu.core_type = #tpu.core_type<tc>, window_params = [{transform_indices = @transform_0, window_bounds = array<i64: 2, 8, 32>}, {transform_indices = @transform_1, window_bounds = array<i64: 2, 8, 32>}, {transform_indices = @transform_2, window_bounds = array<i64: 2, 8, 8>}, {transform_indices = @transform_3, window_bounds = array<i64: 2, 8, 8>}, {transform_indices = @transform_4, window_bounds = array<i64: 1, 32, 96>}, {transform_indices = @transform_5, window_bounds = array<i64: 1, 32, 32>}, {transform_indices = @transform_6, window_bounds = array<i64: 1, 6, 32>}, {transform_indices = @transform_7, window_bounds = array<i64: 1, 32, 96>}, {transform_indices = @transform_8, window_bounds = array<i64: 1, 32, 32>}, {transform_indices = @transform_9, window_bounds = array<i64: 1, 6, 32>}, {transform_indices = @transform_10, window_bounds = array<i64: 1, 32, 128>}, {transform_indices = @transform_11, window_bounds = array<i64: 1, 1, 128>}, {transform_indices = @transform_12, window_bounds = array<i64: 1, 128, 32>}, {transform_indices = @transform_13, window_bounds = array<i64: 1, 3, 32>}, {transform_indices = @transform_14, window_bounds = array<i64: 2, 8, 32>}]} {
    %c0_i32 = arith.constant 0 : i32
    %0 = arith.cmpi eq, %arg1, %c0_i32 : i32
    %1 = arith.extui %0 : i1 to i32
    %c0_i32_0 = arith.constant 0 : i32
    %2 = arith.cmpi ne, %1, %c0_i32_0 : i32
    scf.if %2 {
      %c0_104 = arith.constant 0 : index
      %c0_105 = arith.constant 0 : index
      %c0_106 = arith.constant 0 : index
      %320 = vector.load %arg2[%c0_104, %c0_105, %c0_106] : memref<2x8x32xf32, #tpu.memory_space<vmem>>, vector<2x8x32xf32>
      %321 = vector.shape_cast %320 : vector<2x8x32xf32> to vector<16x32xf32>
      %c0_107 = arith.constant 0 : index
      %c0_108 = arith.constant 0 : index
      %322 = vector.load %arg17[%c0_107, %c0_108] : memref<16x32xf32, #tpu.memory_space<vmem>>, vector<16x32xf32>
      tpu.vector_store %arg17[%c0_107, %c0_108], %321 {strides = array<i32>} : memref<16x32xf32, #tpu.memory_space<vmem>>, vector<16x32xf32>,
    } else {
    }
    %c0 = arith.constant 0 : index
    %c0_1 = arith.constant 0 : index
    %3 = vector.load %arg17[%c0, %c0_1] : memref<16x32xf32, #tpu.memory_space<vmem>>, vector<16x32xf32>
    %c0_2 = arith.constant 0 : index
    %c0_3 = arith.constant 0 : index
    %c0_4 = arith.constant 0 : index
    %4 = vector.load %arg3[%c0_2, %c0_3, %c0_4] : memref<2x8x32xbf16, #tpu.memory_space<vmem>>, vector<2x8x32xbf16>
    %5 = vector.shape_cast %4 : vector<2x8x32xbf16> to vector<16x32xbf16>
    %c0_5 = arith.constant 0 : index
    %c0_6 = arith.constant 0 : index
    %c0_7 = arith.constant 0 : index
    %6 = vector.load %arg4[%c0_5, %c0_6, %c0_7] : memref<2x8x8xbf16, #tpu.memory_space<vmem>>, vector<2x8x8xbf16>
    %cst = arith.constant 0.000000e+00 : bf16
    %7 = vector.broadcast %cst : bf16 to vector<2x8x8xbf16>
    %8 = arith.cmpf ogt, %6, %7 : vector<2x8x8xbf16>
    %cst_8 = arith.constant 0.000000e+00 : f32
    %cst_9 = arith.constant -1.000000e+09 : f32
    %9 = vector.broadcast %cst_8 : f32 to vector<2x8x8xf32>
    %10 = vector.broadcast %cst_9 : f32 to vector<2x8x8xf32>
    %11 = arith.select %8, %9, %10 : vector<2x8x8xi1>, vector<2x8x8xf32>
    %c0_10 = arith.constant 0 : index
    %c0_11 = arith.constant 0 : index
    %c0_12 = arith.constant 0 : index
    %12 = vector.load %arg5[%c0_10, %c0_11, %c0_12] : memref<2x8x8xbf16, #tpu.memory_space<vmem>>, vector<2x8x8xbf16>
    %cst_13 = arith.constant 0.000000e+00 : bf16
    %13 = vector.broadcast %cst_13 : bf16 to vector<2x8x8xbf16>
    %14 = arith.cmpf ogt, %12, %13 : vector<2x8x8xbf16>
    %cst_14 = arith.constant 0.000000e+00 : f32
    %cst_15 = arith.constant -1.000000e+09 : f32
    %15 = vector.broadcast %cst_14 : f32 to vector<2x8x8xf32>
    %16 = vector.broadcast %cst_15 : f32 to vector<2x8x8xf32>
    %17 = arith.select %14, %15, %16 : vector<2x8x8xi1>, vector<2x8x8xf32>
    %c0_16 = arith.constant 0 : index
    %c0_17 = arith.constant 0 : index
    %c0_18 = arith.constant 0 : index
    %18 = vector.load %arg6[%c0_16, %c0_17, %c0_18] : memref<1x32x96xbf16, #tpu.memory_space<vmem>>, vector<1x32x96xbf16>
    %19 = vector.shape_cast %18 : vector<1x32x96xbf16> to vector<32x96xbf16>
    %c0_19 = arith.constant 0 : index
    %c0_20 = arith.constant 0 : index
    %c0_21 = arith.constant 0 : index
    %20 = vector.load %arg7[%c0_19, %c0_20, %c0_21] : memref<1x32x32xbf16, #tpu.memory_space<vmem>>, vector<1x32x32xbf16>
    %21 = vector.shape_cast %20 : vector<1x32x32xbf16> to vector<32x32xbf16>
    %c0_22 = arith.constant 0 : index
    %c0_23 = arith.constant 0 : index
    %c0_24 = arith.constant 0 : index
    %22 = vector.load %arg8[%c0_22, %c0_23, %c0_24] : memref<1x6x32xf32, #tpu.memory_space<vmem>>, vector<1x6x32xf32>
    %23 = vector.shape_cast %22 : vector<1x6x32xf32> to vector<6x32xf32>
    %c0_25 = arith.constant 0 : index
    %c0_26 = arith.constant 0 : index
    %c0_27 = arith.constant 0 : index
    %24 = vector.load %arg9[%c0_25, %c0_26, %c0_27] : memref<1x32x96xbf16, #tpu.memory_space<vmem>>, vector<1x32x96xbf16>
    %25 = vector.shape_cast %24 : vector<1x32x96xbf16> to vector<32x96xbf16>
    %c0_28 = arith.constant 0 : index
    %c0_29 = arith.constant 0 : index
    %c0_30 = arith.constant 0 : index
    %26 = vector.load %arg10[%c0_28, %c0_29, %c0_30] : memref<1x32x32xbf16, #tpu.memory_space<vmem>>, vector<1x32x32xbf16>
    %27 = vector.shape_cast %26 : vector<1x32x32xbf16> to vector<32x32xbf16>
    %c0_31 = arith.constant 0 : index
    %c0_32 = arith.constant 0 : index
    %c0_33 = arith.constant 0 : index
    %28 = vector.load %arg11[%c0_31, %c0_32, %c0_33] : memref<1x6x32xf32, #tpu.memory_space<vmem>>, vector<1x6x32xf32>
    %29 = vector.shape_cast %28 : vector<1x6x32xf32> to vector<6x32xf32>
    %c0_34 = arith.constant 0 : index
    %c0_35 = arith.constant 0 : index
    %c0_36 = arith.constant 0 : index
    %30 = vector.load %arg12[%c0_34, %c0_35, %c0_36] : memref<1x32x128xbf16, #tpu.memory_space<vmem>>, vector<1x32x128xbf16>
    %31 = vector.shape_cast %30 : vector<1x32x128xbf16> to vector<32x128xbf16>
    %c0_37 = arith.constant 0 : index
    %c0_38 = arith.constant 0 : index
    %c0_39 = arith.constant 0 : index
    %32 = vector.load %arg13[%c0_37, %c0_38, %c0_39] : memref<1x1x128xf32, #tpu.memory_space<vmem>>, vector<1x1x128xf32>
    %33 = vector.shape_cast %32 : vector<1x1x128xf32> to vector<1x128xf32>
    %c0_40 = arith.constant 0 : index
    %c0_41 = arith.constant 0 : index
    %c0_42 = arith.constant 0 : index
    %34 = vector.load %arg14[%c0_40, %c0_41, %c0_42] : memref<1x128x32xbf16, #tpu.memory_space<vmem>>, vector<1x128x32xbf16>
    %35 = vector.shape_cast %34 : vector<1x128x32xbf16> to vector<128x32xbf16>
    %c0_43 = arith.constant 0 : index
    %c0_44 = arith.constant 0 : index
    %c0_45 = arith.constant 0 : index
    %36 = vector.load %arg15[%c0_43, %c0_44, %c0_45] : memref<1x3x32xf32, #tpu.memory_space<vmem>>, vector<1x3x32xf32>
    %37 = vector.shape_cast %36 : vector<1x3x32xf32> to vector<3x32xf32>
    %38 = arith.truncf %3 : vector<16x32xf32> to vector<16x32xbf16>
    %cst_46 = arith.constant dense<0.000000e+00> : vector<16x96xf32>
    %39 = tpu.matmul %38, %19, %cst_46 {dimension_numbers = #tpu.dot_dimension_numbers<[1], [0], [0], [1], [0, 0, 1, 1], [], []>} : vector<16x32xbf16>, vector<32x96xbf16>, vector<16x96xf32> -> vector<16x96xf32>
    %40 = vector.extract_strided_slice %39 {offsets = [0, 0], sizes = [16, 32], strides = [1, 1]} : vector<16x96xf32> to vector<16x32xf32>
    %41 = vector.extract_strided_slice %23 {offsets = [0, 0], sizes = [1, 32], strides = [1, 1]} : vector<6x32xf32> to vector<1x32xf32>
    %42 = vector.broadcast %41 : vector<1x32xf32> to vector<16x32xf32>
    %43 = arith.addf %40, %42 : vector<16x32xf32>
    %44 = vector.extract_strided_slice %39 {offsets = [0, 32], sizes = [16, 32], strides = [1, 1]} : vector<16x96xf32> to vector<16x32xf32>
    %45 = vector.extract_strided_slice %23 {offsets = [1, 0], sizes = [1, 32], strides = [1, 1]} : vector<6x32xf32> to vector<1x32xf32>
    %46 = vector.broadcast %45 : vector<1x32xf32> to vector<16x32xf32>
    %47 = arith.addf %44, %46 : vector<16x32xf32>
    %48 = vector.extract_strided_slice %39 {offsets = [0, 64], sizes = [16, 32], strides = [1, 1]} : vector<16x96xf32> to vector<16x32xf32>
    %49 = vector.extract_strided_slice %23 {offsets = [2, 0], sizes = [1, 32], strides = [1, 1]} : vector<6x32xf32> to vector<1x32xf32>
    %50 = vector.broadcast %49 : vector<1x32xf32> to vector<16x32xf32>
    %51 = arith.addf %48, %50 : vector<16x32xf32>
    %52 = vector.shape_cast %43 : vector<16x32xf32> to vector<2x8x32xf32>
    %53 = arith.truncf %52 : vector<2x8x32xf32> to vector<2x8x32xbf16>
    %54 = vector.shape_cast %47 : vector<16x32xf32> to vector<2x8x32xf32>
    %55 = arith.truncf %54 : vector<2x8x32xf32> to vector<2x8x32xbf16>
    %56 = vector.shape_cast %51 : vector<16x32xf32> to vector<2x8x32xf32>
    %57 = arith.truncf %56 : vector<2x8x32xf32> to vector<2x8x32xbf16>
    %58 = vector.extract_strided_slice %53 {offsets = [0, 0, 0], sizes = [2, 8, 8], strides = [1, 1, 1]} : vector<2x8x32xbf16> to vector<2x8x8xbf16>
    %59 = vector.extract_strided_slice %55 {offsets = [0, 0, 0], sizes = [2, 8, 8], strides = [1, 1, 1]} : vector<2x8x32xbf16> to vector<2x8x8xbf16>
    "tpu.trace_start"() <{level = 10 : i32, message = "bqd,bkd->bqk"}> : () -> ()
    %cst_47 = arith.constant dense<0.000000e+00> : vector<2x8x8xf32>
    %60 = tpu.matmul %58, %59, %cst_47 {dimension_numbers = #tpu.dot_dimension_numbers<[2], [2], [1], [1], [0, 0, 0, 1, 1, 1], [0], [0]>} : vector<2x8x8xbf16>, vector<2x8x8xbf16>, vector<2x8x8xf32> -> vector<2x8x8xf32>
    "tpu.trace_stop"() : () -> ()
    %61 = arith.addf %60, %11 : vector<2x8x8xf32>
    %cst_48 = arith.constant dense<0xFF800000> : vector<2x8xf32>
    %62 = vector.multi_reduction <maximumf>, %61, %cst_48 [2] : vector<2x8x8xf32> to vector<2x8xf32>
    %63 = vector.shape_cast %62 : vector<2x8xf32> to vector<2x8x1xf32>
    %64 = vector.broadcast %63 : vector<2x8x1xf32> to vector<2x8x8xf32>
    %65 = arith.subf %61, %64 : vector<2x8x8xf32>
    %66 = math.exp %65 : vector<2x8x8xf32>
    %cst_49 = arith.constant dense<0.000000e+00> : vector<2x8xf32>
    %67 = vector.multi_reduction <add>, %66, %cst_49 [2] : vector<2x8x8xf32> to vector<2x8xf32>
    %68 = vector.shape_cast %67 : vector<2x8xf32> to vector<2x8x1xf32>
    %69 = tpu.reciprocal %68 {approx = true} : vector<2x8x1xf32> -> vector<2x8x1xf32>
    %70 = vector.broadcast %69 : vector<2x8x1xf32> to vector<2x8x8xf32>
    %71 = arith.mulf %66, %70 : vector<2x8x8xf32>
    %72 = arith.truncf %71 : vector<2x8x8xf32> to vector<2x8x8xbf16>
    %73 = vector.extract_strided_slice %57 {offsets = [0, 0, 0], sizes = [2, 8, 8], strides = [1, 1, 1]} : vector<2x8x32xbf16> to vector<2x8x8xbf16>
    "tpu.trace_start"() <{level = 10 : i32, message = "bqk,bkd->bqd"}> : () -> ()
    %cst_50 = arith.constant dense<0.000000e+00> : vector<2x8x8xf32>
    %74 = tpu.matmul %72, %73, %cst_50 {dimension_numbers = #tpu.dot_dimension_numbers<[2], [1], [1], [2], [0, 0, 0, 1, 1, 2], [0], [0]>} : vector<2x8x8xbf16>, vector<2x8x8xbf16>, vector<2x8x8xf32> -> vector<2x8x8xf32>
    "tpu.trace_stop"() : () -> ()
    %75 = vector.extract_strided_slice %53 {offsets = [0, 0, 8], sizes = [2, 8, 8], strides = [1, 1, 1]} : vector<2x8x32xbf16> to vector<2x8x8xbf16>
    %76 = vector.extract_strided_slice %55 {offsets = [0, 0, 8], sizes = [2, 8, 8], strides = [1, 1, 1]} : vector<2x8x32xbf16> to vector<2x8x8xbf16>
    "tpu.trace_start"() <{level = 10 : i32, message = "bqd,bkd->bqk"}> : () -> ()
    %cst_51 = arith.constant dense<0.000000e+00> : vector<2x8x8xf32>
    %77 = tpu.matmul %75, %76, %cst_51 {dimension_numbers = #tpu.dot_dimension_numbers<[2], [2], [1], [1], [0, 0, 0, 1, 1, 1], [0], [0]>} : vector<2x8x8xbf16>, vector<2x8x8xbf16>, vector<2x8x8xf32> -> vector<2x8x8xf32>
    "tpu.trace_stop"() : () -> ()
    %78 = arith.addf %77, %11 : vector<2x8x8xf32>
    %cst_52 = arith.constant dense<0xFF800000> : vector<2x8xf32>
    %79 = vector.multi_reduction <maximumf>, %78, %cst_52 [2] : vector<2x8x8xf32> to vector<2x8xf32>
    %80 = vector.shape_cast %79 : vector<2x8xf32> to vector<2x8x1xf32>
    %81 = vector.broadcast %80 : vector<2x8x1xf32> to vector<2x8x8xf32>
    %82 = arith.subf %78, %81 : vector<2x8x8xf32>
    %83 = math.exp %82 : vector<2x8x8xf32>
    %cst_53 = arith.constant dense<0.000000e+00> : vector<2x8xf32>
    %84 = vector.multi_reduction <add>, %83, %cst_53 [2] : vector<2x8x8xf32> to vector<2x8xf32>
    %85 = vector.shape_cast %84 : vector<2x8xf32> to vector<2x8x1xf32>
    %86 = tpu.reciprocal %85 {approx = true} : vector<2x8x1xf32> -> vector<2x8x1xf32>
    %87 = vector.broadcast %86 : vector<2x8x1xf32> to vector<2x8x8xf32>
    %88 = arith.mulf %83, %87 : vector<2x8x8xf32>
    %89 = arith.truncf %88 : vector<2x8x8xf32> to vector<2x8x8xbf16>
    %90 = vector.extract_strided_slice %57 {offsets = [0, 0, 8], sizes = [2, 8, 8], strides = [1, 1, 1]} : vector<2x8x32xbf16> to vector<2x8x8xbf16>
    "tpu.trace_start"() <{level = 10 : i32, message = "bqk,bkd->bqd"}> : () -> ()
    %cst_54 = arith.constant dense<0.000000e+00> : vector<2x8x8xf32>
    %91 = tpu.matmul %89, %90, %cst_54 {dimension_numbers = #tpu.dot_dimension_numbers<[2], [1], [1], [2], [0, 0, 0, 1, 1, 2], [0], [0]>} : vector<2x8x8xbf16>, vector<2x8x8xbf16>, vector<2x8x8xf32> -> vector<2x8x8xf32>
    "tpu.trace_stop"() : () -> ()
    %92 = vector.extract_strided_slice %53 {offsets = [0, 0, 16], sizes = [2, 8, 8], strides = [1, 1, 1]} : vector<2x8x32xbf16> to vector<2x8x8xbf16>
    %93 = vector.extract_strided_slice %55 {offsets = [0, 0, 16], sizes = [2, 8, 8], strides = [1, 1, 1]} : vector<2x8x32xbf16> to vector<2x8x8xbf16>
    "tpu.trace_start"() <{level = 10 : i32, message = "bqd,bkd->bqk"}> : () -> ()
    %cst_55 = arith.constant dense<0.000000e+00> : vector<2x8x8xf32>
    %94 = tpu.matmul %92, %93, %cst_55 {dimension_numbers = #tpu.dot_dimension_numbers<[2], [2], [1], [1], [0, 0, 0, 1, 1, 1], [0], [0]>} : vector<2x8x8xbf16>, vector<2x8x8xbf16>, vector<2x8x8xf32> -> vector<2x8x8xf32>
    "tpu.trace_stop"() : () -> ()
    %95 = arith.addf %94, %11 : vector<2x8x8xf32>
    %cst_56 = arith.constant dense<0xFF800000> : vector<2x8xf32>
    %96 = vector.multi_reduction <maximumf>, %95, %cst_56 [2] : vector<2x8x8xf32> to vector<2x8xf32>
    %97 = vector.shape_cast %96 : vector<2x8xf32> to vector<2x8x1xf32>
    %98 = vector.broadcast %97 : vector<2x8x1xf32> to vector<2x8x8xf32>
    %99 = arith.subf %95, %98 : vector<2x8x8xf32>
    %100 = math.exp %99 : vector<2x8x8xf32>
    %cst_57 = arith.constant dense<0.000000e+00> : vector<2x8xf32>
    %101 = vector.multi_reduction <add>, %100, %cst_57 [2] : vector<2x8x8xf32> to vector<2x8xf32>
    %102 = vector.shape_cast %101 : vector<2x8xf32> to vector<2x8x1xf32>
    %103 = tpu.reciprocal %102 {approx = true} : vector<2x8x1xf32> -> vector<2x8x1xf32>
    %104 = vector.broadcast %103 : vector<2x8x1xf32> to vector<2x8x8xf32>
    %105 = arith.mulf %100, %104 : vector<2x8x8xf32>
    %106 = arith.truncf %105 : vector<2x8x8xf32> to vector<2x8x8xbf16>
    %107 = vector.extract_strided_slice %57 {offsets = [0, 0, 16], sizes = [2, 8, 8], strides = [1, 1, 1]} : vector<2x8x32xbf16> to vector<2x8x8xbf16>
    "tpu.trace_start"() <{level = 10 : i32, message = "bqk,bkd->bqd"}> : () -> ()
    %cst_58 = arith.constant dense<0.000000e+00> : vector<2x8x8xf32>
    %108 = tpu.matmul %106, %107, %cst_58 {dimension_numbers = #tpu.dot_dimension_numbers<[2], [1], [1], [2], [0, 0, 0, 1, 1, 2], [0], [0]>} : vector<2x8x8xbf16>, vector<2x8x8xbf16>, vector<2x8x8xf32> -> vector<2x8x8xf32>
    "tpu.trace_stop"() : () -> ()
    %109 = vector.extract_strided_slice %53 {offsets = [0, 0, 24], sizes = [2, 8, 8], strides = [1, 1, 1]} : vector<2x8x32xbf16> to vector<2x8x8xbf16>
    %110 = vector.extract_strided_slice %55 {offsets = [0, 0, 24], sizes = [2, 8, 8], strides = [1, 1, 1]} : vector<2x8x32xbf16> to vector<2x8x8xbf16>
    "tpu.trace_start"() <{level = 10 : i32, message = "bqd,bkd->bqk"}> : () -> ()
    %cst_59 = arith.constant dense<0.000000e+00> : vector<2x8x8xf32>
    %111 = tpu.matmul %109, %110, %cst_59 {dimension_numbers = #tpu.dot_dimension_numbers<[2], [2], [1], [1], [0, 0, 0, 1, 1, 1], [0], [0]>} : vector<2x8x8xbf16>, vector<2x8x8xbf16>, vector<2x8x8xf32> -> vector<2x8x8xf32>
    "tpu.trace_stop"() : () -> ()
    %112 = arith.addf %111, %11 : vector<2x8x8xf32>
    %cst_60 = arith.constant dense<0xFF800000> : vector<2x8xf32>
    %113 = vector.multi_reduction <maximumf>, %112, %cst_60 [2] : vector<2x8x8xf32> to vector<2x8xf32>
    %114 = vector.shape_cast %113 : vector<2x8xf32> to vector<2x8x1xf32>
    %115 = vector.broadcast %114 : vector<2x8x1xf32> to vector<2x8x8xf32>
    %116 = arith.subf %112, %115 : vector<2x8x8xf32>
    %117 = math.exp %116 : vector<2x8x8xf32>
    %cst_61 = arith.constant dense<0.000000e+00> : vector<2x8xf32>
    %118 = vector.multi_reduction <add>, %117, %cst_61 [2] : vector<2x8x8xf32> to vector<2x8xf32>
    %119 = vector.shape_cast %118 : vector<2x8xf32> to vector<2x8x1xf32>
    %120 = tpu.reciprocal %119 {approx = true} : vector<2x8x1xf32> -> vector<2x8x1xf32>
    %121 = vector.broadcast %120 : vector<2x8x1xf32> to vector<2x8x8xf32>
    %122 = arith.mulf %117, %121 : vector<2x8x8xf32>
    %123 = arith.truncf %122 : vector<2x8x8xf32> to vector<2x8x8xbf16>
    %124 = vector.extract_strided_slice %57 {offsets = [0, 0, 24], sizes = [2, 8, 8], strides = [1, 1, 1]} : vector<2x8x32xbf16> to vector<2x8x8xbf16>
    "tpu.trace_start"() <{level = 10 : i32, message = "bqk,bkd->bqd"}> : () -> ()
    %cst_62 = arith.constant dense<0.000000e+00> : vector<2x8x8xf32>
    %125 = tpu.matmul %123, %124, %cst_62 {dimension_numbers = #tpu.dot_dimension_numbers<[2], [1], [1], [2], [0, 0, 0, 1, 1, 2], [0], [0]>} : vector<2x8x8xbf16>, vector<2x8x8xbf16>, vector<2x8x8xf32> -> vector<2x8x8xf32>
    "tpu.trace_stop"() : () -> ()
    %126 = tpu.concatenate %74, %91, %108, %125 in 2 : vector<2x8x8xf32>, vector<2x8x8xf32>, vector<2x8x8xf32>, vector<2x8x8xf32> -> vector<2x8x32xf32>
    %127 = vector.shape_cast %126 : vector<2x8x32xf32> to vector<16x32xf32>
    %128 = arith.truncf %127 : vector<16x32xf32> to vector<16x32xbf16>
    %cst_63 = arith.constant dense<0.000000e+00> : vector<16x32xf32>
    %129 = tpu.matmul %128, %21, %cst_63 {dimension_numbers = #tpu.dot_dimension_numbers<[1], [0], [0], [1], [0, 0, 1, 1], [], []>} : vector<16x32xbf16>, vector<32x32xbf16>, vector<16x32xf32> -> vector<16x32xf32>
    %130 = vector.extract_strided_slice %23 {offsets = [3, 0], sizes = [1, 32], strides = [1, 1]} : vector<6x32xf32> to vector<1x32xf32>
    %131 = vector.broadcast %130 : vector<1x32xf32> to vector<16x32xf32>
    %132 = arith.addf %129, %131 : vector<16x32xf32>
    %133 = arith.addf %3, %132 : vector<16x32xf32>
    %134 = vector.extract_strided_slice %23 {offsets = [4, 0], sizes = [1, 32], strides = [1, 1]} : vector<6x32xf32> to vector<1x32xf32>
    %135 = vector.extract_strided_slice %23 {offsets = [5, 0], sizes = [1, 32], strides = [1, 1]} : vector<6x32xf32> to vector<1x32xf32>
    %cst_64 = arith.constant dense<0.000000e+00> : vector<16xf32>
    %136 = vector.multi_reduction <add>, %133, %cst_64 [1] : vector<16x32xf32> to vector<16xf32>
    %137 = vector.shape_cast %136 : vector<16xf32> to vector<16x1xf32>
    %cst_65 = arith.constant 3.200000e+01 : f32
    %138 = vector.broadcast %cst_65 : f32 to vector<16x1xf32>
    %139 = arith.divf %137, %138 : vector<16x1xf32>
    %140 = vector.broadcast %139 : vector<16x1xf32> to vector<16x32xf32>
    %141 = arith.subf %133, %140 : vector<16x32xf32>
    %142 = arith.mulf %141, %141 : vector<16x32xf32>
    %cst_66 = arith.constant dense<0.000000e+00> : vector<16xf32>
    %143 = vector.multi_reduction <add>, %142, %cst_66 [1] : vector<16x32xf32> to vector<16xf32>
    %144 = vector.shape_cast %143 : vector<16xf32> to vector<16x1xf32>
    %cst_67 = arith.constant 3.200000e+01 : f32
    %145 = vector.broadcast %cst_67 : f32 to vector<16x1xf32>
    %146 = arith.divf %144, %145 : vector<16x1xf32>
    %147 = vector.broadcast %139 : vector<16x1xf32> to vector<16x32xf32>
    %148 = arith.subf %133, %147 : vector<16x32xf32>
    %cst_68 = arith.constant 9.99999974E-6 : f32
    %149 = vector.broadcast %cst_68 : f32 to vector<16x1xf32>
    %150 = arith.addf %146, %149 : vector<16x1xf32>
    %151 = math.rsqrt %150 : vector<16x1xf32>
    %152 = vector.broadcast %151 : vector<16x1xf32> to vector<16x32xf32>
    %153 = arith.mulf %148, %152 : vector<16x32xf32>
    %154 = vector.broadcast %134 : vector<1x32xf32> to vector<16x32xf32>
    %155 = arith.mulf %153, %154 : vector<16x32xf32>
    %156 = vector.broadcast %135 : vector<1x32xf32> to vector<16x32xf32>
    %157 = arith.addf %155, %156 : vector<16x32xf32>
    %158 = arith.truncf %157 : vector<16x32xf32> to vector<16x32xbf16>
    %159 = vector.extract_strided_slice %25 {offsets = [0, 0], sizes = [32, 32], strides = [1, 1]} : vector<32x96xbf16> to vector<32x32xbf16>
    %cst_69 = arith.constant dense<0.000000e+00> : vector<16x32xf32>
    %160 = tpu.matmul %158, %159, %cst_69 {dimension_numbers = #tpu.dot_dimension_numbers<[1], [0], [0], [1], [0, 0, 1, 1], [], []>} : vector<16x32xbf16>, vector<32x32xbf16>, vector<16x32xf32> -> vector<16x32xf32>
    %161 = vector.extract_strided_slice %29 {offsets = [0, 0], sizes = [1, 32], strides = [1, 1]} : vector<6x32xf32> to vector<1x32xf32>
    %162 = vector.broadcast %161 : vector<1x32xf32> to vector<16x32xf32>
    %163 = arith.addf %160, %162 : vector<16x32xf32>
    %164 = vector.extract_strided_slice %25 {offsets = [0, 32], sizes = [32, 64], strides = [1, 1]} : vector<32x96xbf16> to vector<32x64xbf16>
    %cst_70 = arith.constant dense<0.000000e+00> : vector<16x64xf32>
    %165 = tpu.matmul %5, %164, %cst_70 {dimension_numbers = #tpu.dot_dimension_numbers<[1], [0], [0], [1], [0, 0, 1, 1], [], []>} : vector<16x32xbf16>, vector<32x64xbf16>, vector<16x64xf32> -> vector<16x64xf32>
    %166 = vector.extract_strided_slice %165 {offsets = [0, 0], sizes = [16, 32], strides = [1, 1]} : vector<16x64xf32> to vector<16x32xf32>
    %167 = vector.extract_strided_slice %29 {offsets = [1, 0], sizes = [1, 32], strides = [1, 1]} : vector<6x32xf32> to vector<1x32xf32>
    %168 = vector.broadcast %167 : vector<1x32xf32> to vector<16x32xf32>
    %169 = arith.addf %166, %168 : vector<16x32xf32>
    %170 = vector.extract_strided_slice %165 {offsets = [0, 32], sizes = [16, 32], strides = [1, 1]} : vector<16x64xf32> to vector<16x32xf32>
    %171 = vector.extract_strided_slice %29 {offsets = [2, 0], sizes = [1, 32], strides = [1, 1]} : vector<6x32xf32> to vector<1x32xf32>
    %172 = vector.broadcast %171 : vector<1x32xf32> to vector<16x32xf32>
    %173 = arith.addf %170, %172 : vector<16x32xf32>
    %174 = vector.shape_cast %163 : vector<16x32xf32> to vector<2x8x32xf32>
    %175 = arith.truncf %174 : vector<2x8x32xf32> to vector<2x8x32xbf16>
    %176 = vector.shape_cast %169 : vector<16x32xf32> to vector<2x8x32xf32>
    %177 = arith.truncf %176 : vector<2x8x32xf32> to vector<2x8x32xbf16>
    %178 = vector.shape_cast %173 : vector<16x32xf32> to vector<2x8x32xf32>
    %179 = arith.truncf %178 : vector<2x8x32xf32> to vector<2x8x32xbf16>
    %180 = vector.extract_strided_slice %175 {offsets = [0, 0, 0], sizes = [2, 8, 8], strides = [1, 1, 1]} : vector<2x8x32xbf16> to vector<2x8x8xbf16>
    %181 = vector.extract_strided_slice %177 {offsets = [0, 0, 0], sizes = [2, 8, 8], strides = [1, 1, 1]} : vector<2x8x32xbf16> to vector<2x8x8xbf16>
    "tpu.trace_start"() <{level = 10 : i32, message = "bqd,bkd->bqk"}> : () -> ()
    %cst_71 = arith.constant dense<0.000000e+00> : vector<2x8x8xf32>
    %182 = tpu.matmul %180, %181, %cst_71 {dimension_numbers = #tpu.dot_dimension_numbers<[2], [2], [1], [1], [0, 0, 0, 1, 1, 1], [0], [0]>} : vector<2x8x8xbf16>, vector<2x8x8xbf16>, vector<2x8x8xf32> -> vector<2x8x8xf32>
    "tpu.trace_stop"() : () -> ()
    %183 = arith.addf %182, %17 : vector<2x8x8xf32>
    %cst_72 = arith.constant dense<0xFF800000> : vector<2x8xf32>
    %184 = vector.multi_reduction <maximumf>, %183, %cst_72 [2] : vector<2x8x8xf32> to vector<2x8xf32>
    %185 = vector.shape_cast %184 : vector<2x8xf32> to vector<2x8x1xf32>
    %186 = vector.broadcast %185 : vector<2x8x1xf32> to vector<2x8x8xf32>
    %187 = arith.subf %183, %186 : vector<2x8x8xf32>
    %188 = math.exp %187 : vector<2x8x8xf32>
    %cst_73 = arith.constant dense<0.000000e+00> : vector<2x8xf32>
    %189 = vector.multi_reduction <add>, %188, %cst_73 [2] : vector<2x8x8xf32> to vector<2x8xf32>
    %190 = vector.shape_cast %189 : vector<2x8xf32> to vector<2x8x1xf32>
    %191 = tpu.reciprocal %190 {approx = true} : vector<2x8x1xf32> -> vector<2x8x1xf32>
    %192 = vector.broadcast %191 : vector<2x8x1xf32> to vector<2x8x8xf32>
    %193 = arith.mulf %188, %192 : vector<2x8x8xf32>
    %194 = arith.truncf %193 : vector<2x8x8xf32> to vector<2x8x8xbf16>
    %195 = vector.extract_strided_slice %179 {offsets = [0, 0, 0], sizes = [2, 8, 8], strides = [1, 1, 1]} : vector<2x8x32xbf16> to vector<2x8x8xbf16>
    "tpu.trace_start"() <{level = 10 : i32, message = "bqk,bkd->bqd"}> : () -> ()
    %cst_74 = arith.constant dense<0.000000e+00> : vector<2x8x8xf32>
    %196 = tpu.matmul %194, %195, %cst_74 {dimension_numbers = #tpu.dot_dimension_numbers<[2], [1], [1], [2], [0, 0, 0, 1, 1, 2], [0], [0]>} : vector<2x8x8xbf16>, vector<2x8x8xbf16>, vector<2x8x8xf32> -> vector<2x8x8xf32>
    "tpu.trace_stop"() : () -> ()
    %197 = vector.extract_strided_slice %175 {offsets = [0, 0, 8], sizes = [2, 8, 8], strides = [1, 1, 1]} : vector<2x8x32xbf16> to vector<2x8x8xbf16>
    %198 = vector.extract_strided_slice %177 {offsets = [0, 0, 8], sizes = [2, 8, 8], strides = [1, 1, 1]} : vector<2x8x32xbf16> to vector<2x8x8xbf16>
    "tpu.trace_start"() <{level = 10 : i32, message = "bqd,bkd->bqk"}> : () -> ()
    %cst_75 = arith.constant dense<0.000000e+00> : vector<2x8x8xf32>
    %199 = tpu.matmul %197, %198, %cst_75 {dimension_numbers = #tpu.dot_dimension_numbers<[2], [2], [1], [1], [0, 0, 0, 1, 1, 1], [0], [0]>} : vector<2x8x8xbf16>, vector<2x8x8xbf16>, vector<2x8x8xf32> -> vector<2x8x8xf32>
    "tpu.trace_stop"() : () -> ()
    %200 = arith.addf %199, %17 : vector<2x8x8xf32>
    %cst_76 = arith.constant dense<0xFF800000> : vector<2x8xf32>
    %201 = vector.multi_reduction <maximumf>, %200, %cst_76 [2] : vector<2x8x8xf32> to vector<2x8xf32>
    %202 = vector.shape_cast %201 : vector<2x8xf32> to vector<2x8x1xf32>
    %203 = vector.broadcast %202 : vector<2x8x1xf32> to vector<2x8x8xf32>
    %204 = arith.subf %200, %203 : vector<2x8x8xf32>
    %205 = math.exp %204 : vector<2x8x8xf32>
    %cst_77 = arith.constant dense<0.000000e+00> : vector<2x8xf32>
    %206 = vector.multi_reduction <add>, %205, %cst_77 [2] : vector<2x8x8xf32> to vector<2x8xf32>
    %207 = vector.shape_cast %206 : vector<2x8xf32> to vector<2x8x1xf32>
    %208 = tpu.reciprocal %207 {approx = true} : vector<2x8x1xf32> -> vector<2x8x1xf32>
    %209 = vector.broadcast %208 : vector<2x8x1xf32> to vector<2x8x8xf32>
    %210 = arith.mulf %205, %209 : vector<2x8x8xf32>
    %211 = arith.truncf %210 : vector<2x8x8xf32> to vector<2x8x8xbf16>
    %212 = vector.extract_strided_slice %179 {offsets = [0, 0, 8], sizes = [2, 8, 8], strides = [1, 1, 1]} : vector<2x8x32xbf16> to vector<2x8x8xbf16>
    "tpu.trace_start"() <{level = 10 : i32, message = "bqk,bkd->bqd"}> : () -> ()
    %cst_78 = arith.constant dense<0.000000e+00> : vector<2x8x8xf32>
    %213 = tpu.matmul %211, %212, %cst_78 {dimension_numbers = #tpu.dot_dimension_numbers<[2], [1], [1], [2], [0, 0, 0, 1, 1, 2], [0], [0]>} : vector<2x8x8xbf16>, vector<2x8x8xbf16>, vector<2x8x8xf32> -> vector<2x8x8xf32>
    "tpu.trace_stop"() : () -> ()
    %214 = vector.extract_strided_slice %175 {offsets = [0, 0, 16], sizes = [2, 8, 8], strides = [1, 1, 1]} : vector<2x8x32xbf16> to vector<2x8x8xbf16>
    %215 = vector.extract_strided_slice %177 {offsets = [0, 0, 16], sizes = [2, 8, 8], strides = [1, 1, 1]} : vector<2x8x32xbf16> to vector<2x8x8xbf16>
    "tpu.trace_start"() <{level = 10 : i32, message = "bqd,bkd->bqk"}> : () -> ()
    %cst_79 = arith.constant dense<0.000000e+00> : vector<2x8x8xf32>
    %216 = tpu.matmul %214, %215, %cst_79 {dimension_numbers = #tpu.dot_dimension_numbers<[2], [2], [1], [1], [0, 0, 0, 1, 1, 1], [0], [0]>} : vector<2x8x8xbf16>, vector<2x8x8xbf16>, vector<2x8x8xf32> -> vector<2x8x8xf32>
    "tpu.trace_stop"() : () -> ()
    %217 = arith.addf %216, %17 : vector<2x8x8xf32>
    %cst_80 = arith.constant dense<0xFF800000> : vector<2x8xf32>
    %218 = vector.multi_reduction <maximumf>, %217, %cst_80 [2] : vector<2x8x8xf32> to vector<2x8xf32>
    %219 = vector.shape_cast %218 : vector<2x8xf32> to vector<2x8x1xf32>
    %220 = vector.broadcast %219 : vector<2x8x1xf32> to vector<2x8x8xf32>
    %221 = arith.subf %217, %220 : vector<2x8x8xf32>
    %222 = math.exp %221 : vector<2x8x8xf32>
    %cst_81 = arith.constant dense<0.000000e+00> : vector<2x8xf32>
    %223 = vector.multi_reduction <add>, %222, %cst_81 [2] : vector<2x8x8xf32> to vector<2x8xf32>
    %224 = vector.shape_cast %223 : vector<2x8xf32> to vector<2x8x1xf32>
    %225 = tpu.reciprocal %224 {approx = true} : vector<2x8x1xf32> -> vector<2x8x1xf32>
    %226 = vector.broadcast %225 : vector<2x8x1xf32> to vector<2x8x8xf32>
    %227 = arith.mulf %222, %226 : vector<2x8x8xf32>
    %228 = arith.truncf %227 : vector<2x8x8xf32> to vector<2x8x8xbf16>
    %229 = vector.extract_strided_slice %179 {offsets = [0, 0, 16], sizes = [2, 8, 8], strides = [1, 1, 1]} : vector<2x8x32xbf16> to vector<2x8x8xbf16>
    "tpu.trace_start"() <{level = 10 : i32, message = "bqk,bkd->bqd"}> : () -> ()
    %cst_82 = arith.constant dense<0.000000e+00> : vector<2x8x8xf32>
    %230 = tpu.matmul %228, %229, %cst_82 {dimension_numbers = #tpu.dot_dimension_numbers<[2], [1], [1], [2], [0, 0, 0, 1, 1, 2], [0], [0]>} : vector<2x8x8xbf16>, vector<2x8x8xbf16>, vector<2x8x8xf32> -> vector<2x8x8xf32>
    "tpu.trace_stop"() : () -> ()
    %231 = vector.extract_strided_slice %175 {offsets = [0, 0, 24], sizes = [2, 8, 8], strides = [1, 1, 1]} : vector<2x8x32xbf16> to vector<2x8x8xbf16>
    %232 = vector.extract_strided_slice %177 {offsets = [0, 0, 24], sizes = [2, 8, 8], strides = [1, 1, 1]} : vector<2x8x32xbf16> to vector<2x8x8xbf16>
    "tpu.trace_start"() <{level = 10 : i32, message = "bqd,bkd->bqk"}> : () -> ()
    %cst_83 = arith.constant dense<0.000000e+00> : vector<2x8x8xf32>
    %233 = tpu.matmul %231, %232, %cst_83 {dimension_numbers = #tpu.dot_dimension_numbers<[2], [2], [1], [1], [0, 0, 0, 1, 1, 1], [0], [0]>} : vector<2x8x8xbf16>, vector<2x8x8xbf16>, vector<2x8x8xf32> -> vector<2x8x8xf32>
    "tpu.trace_stop"() : () -> ()
    %234 = arith.addf %233, %17 : vector<2x8x8xf32>
    %cst_84 = arith.constant dense<0xFF800000> : vector<2x8xf32>
    %235 = vector.multi_reduction <maximumf>, %234, %cst_84 [2] : vector<2x8x8xf32> to vector<2x8xf32>
    %236 = vector.shape_cast %235 : vector<2x8xf32> to vector<2x8x1xf32>
    %237 = vector.broadcast %236 : vector<2x8x1xf32> to vector<2x8x8xf32>
    %238 = arith.subf %234, %237 : vector<2x8x8xf32>
    %239 = math.exp %238 : vector<2x8x8xf32>
    %cst_85 = arith.constant dense<0.000000e+00> : vector<2x8xf32>
    %240 = vector.multi_reduction <add>, %239, %cst_85 [2] : vector<2x8x8xf32> to vector<2x8xf32>
    %241 = vector.shape_cast %240 : vector<2x8xf32> to vector<2x8x1xf32>
    %242 = tpu.reciprocal %241 {approx = true} : vector<2x8x1xf32> -> vector<2x8x1xf32>
    %243 = vector.broadcast %242 : vector<2x8x1xf32> to vector<2x8x8xf32>
    %244 = arith.mulf %239, %243 : vector<2x8x8xf32>
    %245 = arith.truncf %244 : vector<2x8x8xf32> to vector<2x8x8xbf16>
    %246 = vector.extract_strided_slice %179 {offsets = [0, 0, 24], sizes = [2, 8, 8], strides = [1, 1, 1]} : vector<2x8x32xbf16> to vector<2x8x8xbf16>
    "tpu.trace_start"() <{level = 10 : i32, message = "bqk,bkd->bqd"}> : () -> ()
    %cst_86 = arith.constant dense<0.000000e+00> : vector<2x8x8xf32>
    %247 = tpu.matmul %245, %246, %cst_86 {dimension_numbers = #tpu.dot_dimension_numbers<[2], [1], [1], [2], [0, 0, 0, 1, 1, 2], [0], [0]>} : vector<2x8x8xbf16>, vector<2x8x8xbf16>, vector<2x8x8xf32> -> vector<2x8x8xf32>
    "tpu.trace_stop"() : () -> ()
    %248 = tpu.concatenate %196, %213, %230, %247 in 2 : vector<2x8x8xf32>, vector<2x8x8xf32>, vector<2x8x8xf32>, vector<2x8x8xf32> -> vector<2x8x32xf32>
    %249 = vector.shape_cast %248 : vector<2x8x32xf32> to vector<16x32xf32>
    %250 = arith.truncf %249 : vector<16x32xf32> to vector<16x32xbf16>
    %cst_87 = arith.constant dense<0.000000e+00> : vector<16x32xf32>
    %251 = tpu.matmul %250, %27, %cst_87 {dimension_numbers = #tpu.dot_dimension_numbers<[1], [0], [0], [1], [0, 0, 1, 1], [], []>} : vector<16x32xbf16>, vector<32x32xbf16>, vector<16x32xf32> -> vector<16x32xf32>
    %252 = vector.extract_strided_slice %29 {offsets = [3, 0], sizes = [1, 32], strides = [1, 1]} : vector<6x32xf32> to vector<1x32xf32>
    %253 = vector.broadcast %252 : vector<1x32xf32> to vector<16x32xf32>
    %254 = arith.addf %251, %253 : vector<16x32xf32>
    %255 = arith.addf %157, %254 : vector<16x32xf32>
    %256 = vector.extract_strided_slice %29 {offsets = [4, 0], sizes = [1, 32], strides = [1, 1]} : vector<6x32xf32> to vector<1x32xf32>
    %257 = vector.extract_strided_slice %29 {offsets = [5, 0], sizes = [1, 32], strides = [1, 1]} : vector<6x32xf32> to vector<1x32xf32>
    %cst_88 = arith.constant dense<0.000000e+00> : vector<16xf32>
    %258 = vector.multi_reduction <add>, %255, %cst_88 [1] : vector<16x32xf32> to vector<16xf32>
    %259 = vector.shape_cast %258 : vector<16xf32> to vector<16x1xf32>
    %cst_89 = arith.constant 3.200000e+01 : f32
    %260 = vector.broadcast %cst_89 : f32 to vector<16x1xf32>
    %261 = arith.divf %259, %260 : vector<16x1xf32>
    %262 = vector.broadcast %261 : vector<16x1xf32> to vector<16x32xf32>
    %263 = arith.subf %255, %262 : vector<16x32xf32>
    %264 = arith.mulf %263, %263 : vector<16x32xf32>
    %cst_90 = arith.constant dense<0.000000e+00> : vector<16xf32>
    %265 = vector.multi_reduction <add>, %264, %cst_90 [1] : vector<16x32xf32> to vector<16xf32>
    %266 = vector.shape_cast %265 : vector<16xf32> to vector<16x1xf32>
    %cst_91 = arith.constant 3.200000e+01 : f32
    %267 = vector.broadcast %cst_91 : f32 to vector<16x1xf32>
    %268 = arith.divf %266, %267 : vector<16x1xf32>
    %269 = vector.broadcast %261 : vector<16x1xf32> to vector<16x32xf32>
    %270 = arith.subf %255, %269 : vector<16x32xf32>
    %cst_92 = arith.constant 9.99999974E-6 : f32
    %271 = vector.broadcast %cst_92 : f32 to vector<16x1xf32>
    %272 = arith.addf %268, %271 : vector<16x1xf32>
    %273 = math.rsqrt %272 : vector<16x1xf32>
    %274 = vector.broadcast %273 : vector<16x1xf32> to vector<16x32xf32>
    %275 = arith.mulf %270, %274 : vector<16x32xf32>
    %276 = vector.broadcast %256 : vector<1x32xf32> to vector<16x32xf32>
    %277 = arith.mulf %275, %276 : vector<16x32xf32>
    %278 = vector.broadcast %257 : vector<1x32xf32> to vector<16x32xf32>
    %279 = arith.addf %277, %278 : vector<16x32xf32>
    %280 = arith.truncf %279 : vector<16x32xf32> to vector<16x32xbf16>
    %cst_93 = arith.constant dense<0.000000e+00> : vector<16x128xf32>
    %281 = tpu.matmul %280, %31, %cst_93 {dimension_numbers = #tpu.dot_dimension_numbers<[1], [0], [0], [1], [0, 0, 1, 1], [], []>} : vector<16x32xbf16>, vector<32x128xbf16>, vector<16x128xf32> -> vector<16x128xf32>
    %282 = vector.broadcast %33 : vector<1x128xf32> to vector<16x128xf32>
    %283 = arith.addf %281, %282 : vector<16x128xf32>
    %cst_94 = arith.constant 0.000000e+00 : f32
    %284 = vector.broadcast %cst_94 : f32 to vector<16x128xf32>
    %285 = arith.maximumf %283, %284 : vector<16x128xf32>
    %286 = arith.truncf %285 : vector<16x128xf32> to vector<16x128xbf16>
    %cst_95 = arith.constant dense<0.000000e+00> : vector<16x32xf32>
    %287 = tpu.matmul %286, %35, %cst_95 {dimension_numbers = #tpu.dot_dimension_numbers<[1], [0], [0], [1], [0, 0, 1, 1], [], []>} : vector<16x128xbf16>, vector<128x32xbf16>, vector<16x32xf32> -> vector<16x32xf32>
    %288 = vector.extract_strided_slice %37 {offsets = [0, 0], sizes = [1, 32], strides = [1, 1]} : vector<3x32xf32> to vector<1x32xf32>
    %289 = vector.broadcast %288 : vector<1x32xf32> to vector<16x32xf32>
    %290 = arith.addf %287, %289 : vector<16x32xf32>
    %291 = arith.addf %279, %290 : vector<16x32xf32>
    %292 = vector.extract_strided_slice %37 {offsets = [1, 0], sizes = [1, 32], strides = [1, 1]} : vector<3x32xf32> to vector<1x32xf32>
    %293 = vector.extract_strided_slice %37 {offsets = [2, 0], sizes = [1, 32], strides = [1, 1]} : vector<3x32xf32> to vector<1x32xf32>
    %cst_96 = arith.constant dense<0.000000e+00> : vector<16xf32>
    %294 = vector.multi_reduction <add>, %291, %cst_96 [1] : vector<16x32xf32> to vector<16xf32>
    %295 = vector.shape_cast %294 : vector<16xf32> to vector<16x1xf32>
    %cst_97 = arith.constant 3.200000e+01 : f32
    %296 = vector.broadcast %cst_97 : f32 to vector<16x1xf32>
    %297 = arith.divf %295, %296 : vector<16x1xf32>
    %298 = vector.broadcast %297 : vector<16x1xf32> to vector<16x32xf32>
    %299 = arith.subf %291, %298 : vector<16x32xf32>
    %300 = arith.mulf %299, %299 : vector<16x32xf32>
    %cst_98 = arith.constant dense<0.000000e+00> : vector<16xf32>
    %301 = vector.multi_reduction <add>, %300, %cst_98 [1] : vector<16x32xf32> to vector<16xf32>
    %302 = vector.shape_cast %301 : vector<16xf32> to vector<16x1xf32>
    %cst_99 = arith.constant 3.200000e+01 : f32
    %303 = vector.broadcast %cst_99 : f32 to vector<16x1xf32>
    %304 = arith.divf %302, %303 : vector<16x1xf32>
    %305 = vector.broadcast %297 : vector<16x1xf32> to vector<16x32xf32>
    %306 = arith.subf %291, %305 : vector<16x32xf32>
    %cst_100 = arith.constant 9.99999974E-6 : f32
    %307 = vector.broadcast %cst_100 : f32 to vector<16x1xf32>
    %308 = arith.addf %304, %307 : vector<16x1xf32>
    %309 = math.rsqrt %308 : vector<16x1xf32>
    %310 = vector.broadcast %309 : vector<16x1xf32> to vector<16x32xf32>
    %311 = arith.mulf %306, %310 : vector<16x32xf32>
    %312 = vector.broadcast %292 : vector<1x32xf32> to vector<16x32xf32>
    %313 = arith.mulf %311, %312 : vector<16x32xf32>
    %314 = vector.broadcast %293 : vector<1x32xf32> to vector<16x32xf32>
    %315 = arith.addf %313, %314 : vector<16x32xf32>
    %c0_101 = arith.constant 0 : index
    %c0_102 = arith.constant 0 : index
    %316 = vector.load %arg17[%c0_101, %c0_102] : memref<16x32xf32, #tpu.memory_space<vmem>>, vector<16x32xf32>
    tpu.vector_store %arg17[%c0_101, %c0_102], %315 {strides = array<i32>} : memref<16x32xf32, #tpu.memory_space<vmem>>, vector<16x32xf32>,
    %c1_i32 = arith.constant 1 : i32
    %317 = arith.cmpi eq, %arg1, %c1_i32 : i32
    %318 = arith.extui %317 : i1 to i32
    %c0_i32_103 = arith.constant 0 : i32
    %319 = arith.cmpi ne, %318, %c0_i32_103 : i32
    scf.if %319 {
      %320 = vector.shape_cast %315 : vector<16x32xf32> to vector<2x8x32xf32>
      %321 = arith.truncf %320 : vector<2x8x32xf32> to vector<2x8x32xbf16>
      %c0_104 = arith.constant 0 : index
      %c0_105 = arith.constant 0 : index
      %c0_106 = arith.constant 0 : index
      %322 = vector.load %arg16[%c0_104, %c0_105, %c0_106] : memref<2x8x32xbf16, #tpu.memory_space<vmem>>, vector<2x8x32xbf16>
      tpu.vector_store %arg16[%c0_104, %c0_105, %c0_106], %321 {strides = array<i32>} : memref<2x8x32xbf16, #tpu.memory_space<vmem>>, vector<2x8x32xbf16>,
    } else {
    }
    return
  }
  func.func @transform_0(%arg0: i32, %arg1: i32) -> (i32, i32, i32) {
    %c0_i32 = arith.constant 0 : i32
    %c0_i32_0 = arith.constant 0 : i32
    %c0_i32_1 = arith.constant 0 : i32
    return %arg0, %c0_i32, %c0_i32_0 : i32, i32, i32
  }
  func.func @transform_1(%arg0: i32, %arg1: i32) -> (i32, i32, i32) {
    %c0_i32 = arith.constant 0 : i32
    %c0_i32_0 = arith.constant 0 : i32
    %c0_i32_1 = arith.constant 0 : i32
    return %arg0, %c0_i32, %c0_i32_0 : i32, i32, i32
  }
  func.func @transform_2(%arg0: i32, %arg1: i32) -> (i32, i32, i32) {
    %c0_i32 = arith.constant 0 : i32
    %c0_i32_0 = arith.constant 0 : i32
    %c0_i32_1 = arith.constant 0 : i32
    return %arg0, %c0_i32, %c0_i32_0 : i32, i32, i32
  }
  func.func @transform_3(%arg0: i32, %arg1: i32) -> (i32, i32, i32) {
    %c0_i32 = arith.constant 0 : i32
    %c0_i32_0 = arith.constant 0 : i32
    %c0_i32_1 = arith.constant 0 : i32
    return %arg0, %c0_i32, %c0_i32_0 : i32, i32, i32
  }
  func.func @transform_4(%arg0: i32, %arg1: i32) -> (i32, i32, i32) {
    %c0_i32 = arith.constant 0 : i32
    %c0_i32_0 = arith.constant 0 : i32
    %c0_i32_1 = arith.constant 0 : i32
    return %arg1, %c0_i32, %c0_i32_0 : i32, i32, i32
  }
  func.func @transform_5(%arg0: i32, %arg1: i32) -> (i32, i32, i32) {
    %c0_i32 = arith.constant 0 : i32
    %c0_i32_0 = arith.constant 0 : i32
    %c0_i32_1 = arith.constant 0 : i32
    return %arg1, %c0_i32, %c0_i32_0 : i32, i32, i32
  }
  func.func @transform_6(%arg0: i32, %arg1: i32) -> (i32, i32, i32) {
    %c0_i32 = arith.constant 0 : i32
    %c0_i32_0 = arith.constant 0 : i32
    %c0_i32_1 = arith.constant 0 : i32
    return %arg1, %c0_i32, %c0_i32_0 : i32, i32, i32
  }
  func.func @transform_7(%arg0: i32, %arg1: i32) -> (i32, i32, i32) {
    %c0_i32 = arith.constant 0 : i32
    %c0_i32_0 = arith.constant 0 : i32
    %c0_i32_1 = arith.constant 0 : i32
    return %arg1, %c0_i32, %c0_i32_0 : i32, i32, i32
  }
  func.func @transform_8(%arg0: i32, %arg1: i32) -> (i32, i32, i32) {
    %c0_i32 = arith.constant 0 : i32
    %c0_i32_0 = arith.constant 0 : i32
    %c0_i32_1 = arith.constant 0 : i32
    return %arg1, %c0_i32, %c0_i32_0 : i32, i32, i32
  }
  func.func @transform_9(%arg0: i32, %arg1: i32) -> (i32, i32, i32) {
    %c0_i32 = arith.constant 0 : i32
    %c0_i32_0 = arith.constant 0 : i32
    %c0_i32_1 = arith.constant 0 : i32
    return %arg1, %c0_i32, %c0_i32_0 : i32, i32, i32
  }
  func.func @transform_10(%arg0: i32, %arg1: i32) -> (i32, i32, i32) {
    %c0_i32 = arith.constant 0 : i32
    %c0_i32_0 = arith.constant 0 : i32
    %c0_i32_1 = arith.constant 0 : i32
    return %arg1, %c0_i32, %c0_i32_0 : i32, i32, i32
  }
  func.func @transform_11(%arg0: i32, %arg1: i32) -> (i32, i32, i32) {
    %c0_i32 = arith.constant 0 : i32
    %c0_i32_0 = arith.constant 0 : i32
    %c0_i32_1 = arith.constant 0 : i32
    return %arg1, %c0_i32, %c0_i32_0 : i32, i32, i32
  }
  func.func @transform_12(%arg0: i32, %arg1: i32) -> (i32, i32, i32) {
    %c0_i32 = arith.constant 0 : i32
    %c0_i32_0 = arith.constant 0 : i32
    %c0_i32_1 = arith.constant 0 : i32
    return %arg1, %c0_i32, %c0_i32_0 : i32, i32, i32
  }
  func.func @transform_13(%arg0: i32, %arg1: i32) -> (i32, i32, i32) {
    %c0_i32 = arith.constant 0 : i32
    %c0_i32_0 = arith.constant 0 : i32
    %c0_i32_1 = arith.constant 0 : i32
    return %arg1, %c0_i32, %c0_i32_0 : i32, i32, i32
  }
  func.func @transform_14(%arg0: i32, %arg1: i32) -> (i32, i32, i32) {
    %c0_i32 = arith.constant 0 : i32
    %c0_i32_0 = arith.constant 0 : i32
    %c0_i32_1 = arith.constant 0 : i32
    return %arg0, %c0_i32, %c0_i32_0 : i32, i32, i32
  }
}

</mosaic_0001>

<bundles_post_ra>
// kernel: decoder_forward.3
= control target key start
LH: loop header
LB: loop body
LE: loop exit
PB: predicated region body
PF: predicated region fallthrough
CT: control target
= control target key end

     0   :  { %vm80_vm0 = vcmask 261120   ;;  %s299_s1 = inlined_call_operand.vmem [shape: bf16[32,512], index: 1, kind: input, shape index: {}]   ;;  %s300_s0 = inlined_call_operand.vmem [shape: bf16[16,32], index: 0, kind: input, shape index: {}]   ;;  %s301_s2 = inlined_call_operand.vmem [shape: f32[1,512], index: 2, kind: input, shape index: {}]   ;;  %s302_s3 = inlined_call_operand.vmem [shape: f32[16,512], index: 3, kind: output, shape index: {}]  }
   0x1   :  { %v174_v0 = vld [vmem:[%s299_s1 + $0x20] sm:$0xf]  ;;  %v199_v1 = vld [vmem:[%s299_s1 + $0x2c] sm:$0xf0]  ;;  %v197_v2 = vld [vmem:[%s299_s1 + $0x24] sm:$0xf] }
   0x2   :  { %v175_v3 = vor.u32 %v199_v1, %v174_v0  ;;  %v176_v4 = vld [vmem:[%s299_s1 + $0x30] sm:$0xf0]  ;;  %v182_v5 = vld [vmem:[%s299_s1 + $0x28] sm:$0xf]  ;;  %v200_v6 = vld [vmem:[%s299_s1 + $0x34] sm:$0xf0] }
   0x3   :  { %v179_v7 = vor.u32 %v197_v2, %v176_v4  ;;  %v183_v8 = vor.u32 %v200_v6, %v182_v5  ;;  %v198_v9 = vld [vmem:[%s299_s1 + $0x2c] sm:$0xf]  ;;  %v184_v10 = vld [vmem:[%s299_s1 + $0x38] sm:$0xf0]  ;;  %v158_v11 = vld [vmem:[%s299_s1] sm:$0xf] }
   0x4   :  { %90 = vmatpush.bf16.msra.mxu0 %v175_v3  ;;  %v187_v12 = vor.u32 %v198_v9, %v184_v10  ;;  %v195_v13 = vld [vmem:[%s299_s1 + $0xc] sm:$0xf0]  ;;  %v193_v14 = vld [vmem:[%s299_s1 + $0x4] sm:$0xf]  ;;  %v160_v15 = vld [vmem:[%s299_s1 + $0x10] sm:$0xf0] }
   0x5   :  { %104 = vmatpush.bf16.msra.mxu1 %v179_v7  ;;  %118 = vmatpush.bf16.msra.mxu2 %v183_v8  ;;  %v159_v16 = vor.u32 %v195_v13, %v158_v11  ;;  %v163_v17 = vor.u32 %v193_v14, %v160_v15  ;;  %v166_v18 = vld [vmem:[%s299_s1 + $0x8] sm:$0xf]  ;;  %v196_v19 = vld [vmem:[%s299_s1 + $0x14] sm:$0xf0]  ;;  %v194_v20 = vld [vmem:[%s299_s1 + $0xc] sm:$0xf] }
   0x6   :  { %132 = vmatpush.bf16.msra.mxu3 %v187_v12  ;;  %v167_v21 = vor.u32 %v196_v19, %v166_v18  ;;  %v168_v22 = vld [vmem:[%s299_s1 + $0x18] sm:$0xf0]  ;;  %v192_v24 = vld [vmem:[%s300_s0] sm:$0xff] }
   0x7   :  { %v171_v23 = vor.u32 %v194_v20, %v168_v22  ;;  %v25_v25 = vld [vmem:[%s301_s2] sm:$0xf] }
   0x8   :  { %91 = vmatpush.bf16.msra.mxu0 %v159_v16  ;;  %v27_v26 = vperm.slane %v25_v25, 0  ;;  %v28_v27 = vperm.slane %v25_v25, 1  ;;  %v29_v32 = vperm.slane %v25_v25, 2  ;;  %v30_v33 = vperm.slane %v25_v25, 3 }
   0x9   :  { %105 = vmatpush.bf16.msra.mxu1 %v163_v17  ;;  %119 = vmatpush.bf16.msra.mxu2 %v167_v21 }
   0xa   :  { %133 = vmatpush.bf16.msra.mxu3 %v171_v23 }
   0xb   :  { %188 = vmatmul.msk.bf16.vlgmr.msra.gmra.mxu0 %vm80_vm0, %v192_v24 }
   0xc   :  { %189 = vmatmul.msk.bf16.vlgmr.msra.gmra.mxu1 %vm80_vm0, %v192_v24  ;;  %190 = vmatmul.msk.bf16.vlgmr.msra.gmra.mxu2 %vm80_vm0, %v192_v24 }
   0xd   :  { %191 = vmatmul.msk.bf16.vlgmr.msra.gmra.mxu3 %vm80_vm0, %v192_v24 }
  0x88   :  { %v93_v28 = vpop.f32.mrf.mxu0 }
  0x89   :  { %v94_v29 = vadd.f32 %v93_v28, %v27_v26  ;;  %v107_v30 = vpop.f32.mrf.mxu1 }
  0x8a   :  { %v108_v31 = vadd.f32 %v107_v30, %v28_v27 }
  0x8b   :  { %140 = vst [vmem:[%s302_s3] sm:$0xff] %v94_v29 }
  0x8c   :  { %141 = vst [vmem:[%s302_s3 + $0x8] sm:$0xff] %v108_v31 }
  0x8f   :  { %v121_v34 = vpop.f32.mrf.mxu2 }
  0x90   :  { %v122_v35 = vadd.f32 %v121_v34, %v29_v32  ;;  %v135_v36 = vpop.f32.mrf.mxu3  ;;  %v95_v37 = vpop.f32.mrf.mxu0 }
  0x91   :  { %v136_v38 = vadd.f32 %v135_v36, %v30_v33  ;;  %v96_v39 = vadd.f32 %v95_v37, %v27_v26  ;;  %v109_v40 = vpop.f32.mrf.mxu1 }
  0x92   :  { %142 = vst [vmem:[%s302_s3 + $0x10] sm:$0xff] %v122_v35  ;;  %v110_v41 = vadd.f32 %v109_v40, %v28_v27 }
  0x93   :  { %143 = vst [vmem:[%s302_s3 + $0x18] sm:$0xff] %v136_v38 }
  0x94   :  { %144 = vst [vmem:[%s302_s3 + $0x20] sm:$0xff] %v96_v39 }
  0x95   :  { %145 = vst [vmem:[%s302_s3 + $0x28] sm:$0xff] %v110_v41 }
  0x97   :  { %v123_v42 = vpop.f32.mrf.mxu2 }
  0x98   :  { %v124_v43 = vadd.f32 %v123_v42, %v29_v32  ;;  %v137_v44 = vpop.f32.mrf.mxu3 }
  0x99   :  { %v138_v45 = vadd.f32 %v137_v44, %v30_v33 }
  0x9a   :  { %146 = vst [vmem:[%s302_s3 + $0x30] sm:$0xff] %v124_v43 }
  0x9b   :  { %147 = vst [vmem:[%s302_s3 + $0x38] sm:$0xff] %v138_v45 }

// kernel: decoder_forward.2
= control target key start
LH: loop header
LB: loop body
LE: loop exit
PB: predicated region body
PF: predicated region fallthrough
CT: control target
= control target key end

     0   :  { %s2921_s29 = smov 0   ;;  %s2923_s30 = smov 0   ;;  %s3371_s0 = inlined_call_operand.vmem [shape: f32[2,8,32], index: 0, kind: input, shape index: {}]   ;;  %s3372_s1 = inlined_call_operand.vmem [shape: bf16[2,8,32], index: 1, kind: input, shape index: {}]   ;;  %s3373_s2 = inlined_call_operand.vmem [shape: bf16[2,8,8], index: 2, kind: input, shape index: {}]   ;;  %s3374_s3 = inlined_call_operand.vmem [shape: bf16[2,8,8], index: 3, kind: input, shape index: {}]   ;;  %s3375_s4 = inlined_call_operand.vmem [shape: bf16[2,32,96], index: 4, kind: input, shape index: {}]   ;;  %s3376_s5 = inlined_call_operand.vmem [shape: bf16[2,32,32], index: 5, kind: input, shape index: {}]   ;;  %s3377_s6 = inlined_call_operand.vmem [shape: f32[2,6,32], index: 6, kind: input, shape index: {}]   ;;  %s3378_s7 = inlined_call_operand.vmem [shape: bf16[2,32,96], index: 7, kind: input, shape index: {}]   ;;  %s3379_s8 = inlined_call_operand.vmem [shape: bf16[2,32,32], index: 8, kind: input, shape index: {}]   ;;  %s3380_s9 = inlined_call_operand.vmem [shape: f32[2,6,32], index: 9, kind: input, shape index: {}]   ;;  %s3381_s10 = inlined_call_operand.vmem [shape: bf16[2,32,128], index: 10, kind: input, shape index: {}]   ;;  %s3382_s11 = inlined_call_operand.vmem [shape: f32[2,1,128], index: 11, kind: input, shape index: {}]   ;;  %s3383_s12 = inlined_call_operand.vmem [shape: bf16[2,128,32], index: 12, kind: input, shape index: {}]   ;;  %s3384_s13 = inlined_call_operand.vmem [shape: f32[2,3,32], index: 13, kind: input, shape index: {}]   ;;  %s3385_s14 = inlined_call_operand.vmem [shape: bf16[2,8,32], index: 14, kind: output, shape index: {}]  }
   0x1   :  { %3389 = sst [smem:[#allocation6_spill]] %s3372_s1  ;;  %s2925_s15 = smov 0  }
   0x2   :  { %3390 = sst [smem:[#allocation7_spill]] %s3374_s3 }
   0x3   :  { %3391 = sst [smem:[#allocation8_spill]] %s3375_s4 }
   0x4   :  { %3392 = sst [smem:[#allocation9_spill]] %s3376_s5 }
   0x5   :  { %3393 = sst [smem:[#allocation10_spill]] %s3377_s6 }
   0x6   :  { %3394 = sst [smem:[#allocation11_spill]] %s3378_s7 }
   0x7   :  { %3395 = sst [smem:[#allocation12_spill]] %s3379_s8 }
   0x8   :  { %3396 = sst [smem:[#allocation13_spill]] %s3385_s14 }
   0x9 LB: > { %3397 = sst [smem:[#allocation3_spill]] %s2823_s30  ;;  %s33_s16 = sadd.s32 1, %s2823_s30  ;;  %s2827_s15 = sphi %s2925_s15, %s24_s15   ;;  %s2823_s30 = sphi %s2923_s30, %s3410_s30   ;;  %s2819_s29 = sphi %s2921_s29, %s3409_s29  }
   0xa   : > { %3398 = sst [smem:[#allocation4_spill]] %s2827_s15  ;;  %p2486_p0 = scmp.ge.s32.totalorder %s2827_s15, 1 }
   0xb   : > { %p34_p1 = scmp.ge.s32.totalorder %s33_s16, 2  ;;  %p553_p2 = scmp.lt.s32.totalorder %s2827_s15, 3 }
   0xd   : > { %s3412_s16 = smov (%p34_p1, %s33_s16), 0  ;;  %p554_p3 = pnand %p2486_p0, %p553_p2 }
   0xe   : > { %3399 = sst [smem:[#allocation5_spill]] %s3412_s16  ;;  %p683_p4 = scmp.lt.s32.totalorder (!%p554_p3), %s2819_s29, 1 }
   0xf   : > { %557 = sbr.rel (%p554_p3) target bundleno = 3449 (0xd79), region = 76  ;;  %s3400_s4 = sld [smem:[#allocation8_spill]] (!%p554_p3) }
  0x10   : > { %s3401_s5 = sld [smem:[#allocation9_spill]] (!%p554_p3)  ;;  %p2502_p5 = scmp.ne.s32.totalorder (!%p554_p3), %s2819_s29, 0 }
  0x11   : > { %s3402_s6 = sld [smem:[#allocation10_spill]] (!%p554_p3) }
  0x12   : > { %s3403_s7 = sld [smem:[#allocation11_spill]] (!%p554_p3) }
  0x13   : > { %s3404_s8 = sld [smem:[#allocation12_spill]] (!%p554_p3) }
  0x14   : > { %s2943_s17 = scalar_select %p683_p4, %s2819_s29, 1 }
  0x16   : > { %s2622_s18 = sshll.u32 %s2943_s17, 4  ;;  %s2491_s19 = sshll.u32 %s2943_s17, 3 }
  0x17   : > { %s687_s22 = scalar_lea.vmem %s3400_s4, %s2622_s18  ;;  %s2953_s25 = scalar_lea.vmem %s3401_s5, %s2622_s18 }
  0x18   : > { %s696_s28 = scalar_lea.vmem %s3402_s6, %s2491_s19  ;;  %s2961_s15 = scalar_lea.vmem %s3403_s7, %s2622_s18 }
  0x19   : > { %s2966_s1 = scalar_lea.vmem %s3404_s8, %s2622_s18  ;;  %s2971_s23 = scalar_lea.vmem %s3380_s9, %s2491_s19 }
  0x1a   : > { %s2976_s26 = scalar_lea.vmem %s3381_s10, %s2622_s18  ;;  %s718_s30 = scalar_lea.vmem %s3382_s11, %s2943_s17 }
  0x1b   : > { %s2627_s16 = sshll.u32 %s2943_s17, 6  ;;  %s2501_s6 = sshll.u32 %s2943_s17, 2 }
  0x1c   : > { %s2987_s14 = scalar_lea.vmem %s3383_s12, %s2627_s16  ;;  %s2992_s19 = scalar_lea.vmem %s3384_s13, %s2501_s6 }
  0x1d   : > { %738 = sbr.rel (%p2502_p5) target bundleno = 37 (0x25), region = 80 }
  0x22   : > { %v739_v0 = vld [vmem:[%s3371_s0] sm:$0xff]  ;;  %vm741_vm0 = vcmask 261120   ;;  %v740_v1 = vld [vmem:[%s3371_s0 + $0x8] sm:$0xff] }
  0x23   : > { %742 = vst.msk [vmem:[#allocation2] sm:$0xff] %vm741_vm0, %v739_v0 }
  0x24   : > { %743 = vst.msk [vmem:[#allocation2 + $0x8] sm:$0xff] %vm741_vm0, %v740_v1 }
  0x25 PF: > { %v2630_v2 = vld [vmem:[%s687_s22 + $0x8] sm:$0xff]  ;;  %v3001_v3 = vld [vmem:[%s696_s28] sm:$0x3f]  ;;  %s2829_s6 = smov 32   ;;  %vm817_vm1 = vcmask 261120   ;;  %s2830_s7 = smov 96  }
  0x26   : > { %827 = vmatpush.bf16.msra.mxu0 %v2630_v2  ;;  %v2629_v4 = vld [vmem:[%s687_s22] sm:$0xff]  ;;  %v838_v7 = vperm.slane %v3001_v3, 1  ;;  %v835_v14 = vperm.slane %v3001_v3, 0  ;;  %s2831_s8 = smov 88   ;;  %s2832_s22 = smov 120   ;;  %v845_v29 = vperm.slane %v3001_v3, 2 }
  0x27   : > { %s2833_s28 = smov 112   ;;  %s2834_s24 = smov 80   ;;  %vm863_vm2 = vcmask 64512   ;;  %v2648_v57 = vld [vmem:[%s3373_s2] sm:$0xff]   ;;  %v2838_v60 = vmov -1e+09  }
  0x28   : > { %840 = vrot.lane.b32.xlu0 %v838_v7, %s2829_s6  ;;  %s2835_s27 = smov 72   ;;  %s2836_s16 = smov 104   ;;  %v2650_v58 = vunpack.c.h.bf16 %v2648_v57  ;;  %v2649_v59 = vunpack.c.l.bf16 %v2648_v57  ;;  %vm939_vm5 = vcmask 1043456   ;;  %vm1348_vm6 = vcmask 130048  }
  0x29   : > { %s2837_s3 = smov 64   ;;  %s2839_s18 = smov 56   ;;  %vm1351_vm7 = vcmask 195584  }
  0x2a   : > { %v3003_v5 = vld [vmem:[#allocation2] sm:$0xff]  ;;  %828 = vmatpush.bf16.msra.mxu0 %v2629_v4  ;;  %vm753_vm3 = vcmp.gt.f32.partialorder %v2650_v58, 0.0  ;;  %vm752_vm4 = vcmp.gt.f32.partialorder %v2649_v59, 0.0  ;;  %s2840_s5 = smov 48   ;;  %s2841_s21 = smov 40  }
  0x2b   : > { %v3005_v6 = vld [vmem:[#allocation2 + $0x8] sm:$0xff]  ;;  %v755_v61 = vsel %vm753_vm3, 0.0, %v2838_v60  ;;  %v754_v1 = vsel %vm752_vm4, 0.0, %v2838_v60  ;;  %s2843_s20 = smov 16   ;;  %s2844_s4 = smov 24  }
  0x2c   : > { %v804_v8 = vpack.c.bf16 %v3005_v6, %v3003_v5  ;;  %p2617_p6 = scmp.ne.s32.totalorder %s2819_s29, 1 }
  0x2e   : > { %2511 = vmatmul.msk.bf16.vlgmr.msra.gmra.mxu0 %vm817_vm1, %v804_v8 }
  0x9a   : > { %v841_v9 = vpop.permute.xlu0 %840 }
  0xab   : > { %v3012_v10 = vpop.f32.mrf.mxu0 }
  0xac   : > { %v843_v11 = vadd.f32 %v841_v9, %v3012_v10  ;;  %v836_v19 = vadd.f32 %v835_v14, %v3012_v10 }
  0xae   : > { %v854_v12 = vpack.c.bf16 %v843_v11, %v843_v11  ;;  %v852_v24 = vpack.c.bf16 %v836_v19, %v836_v19 }
  0xb0   : > { %v859_v13 = vunpack.c.l.b16 %v854_v12  ;;  %v981_v27 = vunpack.c.l.b16 %v852_v24 }
  0xb2   : > { %v860_v15 = vpack.c.b16 %v859_v13, %v859_v13  ;;  %v982_v28 = vpack.c.b16 %v981_v27, %v981_v27 }
  0xb3   : > { %v3016_v16 = vpop.f32.mrf.mxu0 }
  0xb4   : > { %v837_v17 = vadd.f32 %v835_v14, %v3016_v16  ;;  %v844_v18 = vadd.f32 %v841_v9, %v3016_v16  ;;  %861 = vrot.lane.b32.xlu0 %v860_v15, %s2830_s7 }
  0xb6   : > { %v853_v20 = vpack.c.bf16 %v837_v17, %v837_v17  ;;  %v855_v21 = vpack.c.bf16 %v844_v18, %v844_v18 }
  0xb8   : > { %v884_v22 = vunpack.c.l.b16 %v855_v21  ;;  %v1007_v23 = vunpack.c.l.b16 %v853_v20 }
  0xba   : > { %v885_v25 = vpack.c.b16 %v884_v22, %v884_v22  ;;  %v1008_v26 = vpack.c.b16 %v1007_v23, %v1007_v23 }
  0xbc   : > { %1011 = vrot.lane.b32.xlu2 %v885_v25, %s2831_s8  ;;  %886 = vrot.lane.b32.xlu1 %v885_v25, %s2830_s7 }
  0xbd   : > { %1009 = vrot.lane.b32.xlu0 %v1008_v26, %s2832_s22 }
  0xc4   : > { %983 = vrot.lane.b32.xlu2 %v982_v28, %s2832_s22  ;;  %985 = vrot.lane.b32.xlu1 %v860_v15, %s2831_s8 }
  0xc5   : > { %1098 = vrot.lane.b32.xlu0 %v982_v28, %s2833_s28 }
  0xcc   : > { %1123 = vrot.lane.b32.xlu2 %v885_v25, %s2834_s24  ;;  %1100 = vrot.lane.b32.xlu1 %v860_v15, %s2834_s24 }
  0xcd   : > { %1235 = vrot.lane.b32.xlu0 %v885_v25, %s2835_s27 }
  0xd4   : > { %1212 = vrot.lane.b32.xlu2 %v860_v15, %s2835_s27  ;;  %1121 = vrot.lane.b32.xlu1 %v1008_v26, %s2833_s28 }
  0xdc   : > { %1233 = vrot.lane.b32.xlu2 %v1008_v26, %s2836_s16  ;;  %1210 = vrot.lane.b32.xlu1 %v982_v28, %s2836_s16 }
  0xe4   : > { %847 = vrot.lane.b32.xlu1 %v845_v29, %s2837_s3 }
 0x116   : > { %v1012_v30 = vpop.permute.xlu2 %1011 }
 0x117   : > { %v1017_v31 = vsel %vm863_vm2, %v1012_v30, 0 }
 0x118   : > { %1026 = vmatpush.bf16.xpose.msra.mxu1 %v1017_v31 }
 0x11e   : > { %v984_v32 = vpop.permute.xlu2 %983 }
 0x126   : > { %v862_v33 = vpop.permute.xlu0 %861  ;;  %v1124_v34 = vpop.permute.xlu2 %1123 }
 0x127   : > { %v868_v35 = vsel %vm863_vm2, %v862_v33, 0  ;;  %v1129_v36 = vsel %vm863_vm2, %v1124_v34, 0 }
 0x128   : > { %877 = vmatpush.bf16.xpose.msra.mxu2 %v868_v35  ;;  %1138 = vmatpush.bf16.xpose.msrb.mxu1 %v1129_v36 }
 0x12e   : > { %v887_v37 = vpop.permute.xlu1 %886  ;;  %v1213_v43 = vpop.permute.xlu2 %1212 }
 0x12f   : > { %v1010_v38 = vpop.permute.xlu0 %1009  ;;  %2512 = vmatmul.msk.bf16.vlgmr.msra.gmra.mxu2 %vm863_vm2, %v852_v24  ;;  %v892_v39 = vsel %vm863_vm2, %v887_v37, 0  ;;  %v1218_v47 = vsel %vm863_vm2, %v1213_v43, 0 }
 0x130   : > { %2517 = vmatmul.msk.bf16.vlgmr.msra.gmra.mxu1 %vm863_vm2, %v1010_v38  ;;  %901 = vmatpush.bf16.xpose.msrb.mxu2 %v892_v39 }
 0x136   : > { %v986_v40 = vpop.permute.xlu1 %985  ;;  %v1234_v51 = vpop.permute.xlu2 %1233 }
 0x137   : > { %v1099_v41 = vpop.permute.xlu0 %1098  ;;  %v991_v42 = vsel %vm863_vm2, %v986_v40, 0 }
 0x138   : > { %1000 = vmatpush.bf16.xpose.msrb.mxu0 %v991_v42 }
 0x13e   : > { %v1101_v44 = vpop.permute.xlu1 %1100 }
 0x13f   : > { %v1106_v45 = vsel %vm863_vm2, %v1101_v44, 0  ;;  %v1236_v46 = vpop.permute.xlu0 %1235  ;;  %2513 = vmatmul.msk.bf16.vlgmr.msrb.gmra.mxu2 %vm863_vm2, %v853_v20  ;;  %2516 = vmatmul.msk.bf16.vlgmr.msrb.gmra.mxu0 %vm863_vm2, %v984_v32 }
 0x140   : > { %v1241_v48 = vsel %vm863_vm2, %v1236_v46, 0  ;;  %1115 = vmatpush.bf16.xpose.msra.mxu0 %v1106_v45 }
 0x141   : > { %1250 = vmatpush.bf16.xpose.msra.mxu1 %v1241_v48 }
 0x146   : > { %v1122_v49 = vpop.permute.xlu1 %1121 }
 0x147   : > { %2521 = vmatmul.msk.bf16.vlgmr.msrb.gmra.mxu1 %vm863_vm2, %v1122_v49 }
 0x148   : > { %1227 = vmatpush.bf16.xpose.msrb.mxu0 %v1218_v47 }
 0x14e   : > { %v1211_v50 = vpop.permute.xlu1 %1210 }
 0x14f   : > { %2520 = vmatmul.msk.bf16.vlgmr.msra.gmra.mxu0 %vm863_vm2, %v1099_v41 }
 0x156   : > { %v848_v52 = vpop.permute.xlu1 %847 }
 0x157   : > { %v851_v53 = vadd.f32 %v848_v52, %v3016_v16  ;;  %2525 = vmatmul.msk.bf16.vlgmr.msra.gmra.mxu1 %vm863_vm2, %v1234_v51  ;;  %v850_v20 = vadd.f32 %v848_v52, %v3012_v10 }
 0x159   : > { %v857_v54 = vpack.c.bf16 %v851_v53, %v851_v53  ;;  %v856_v24 = vpack.c.bf16 %v850_v20, %v850_v20 }
 0x15b   : > { %v957_v55 = vunpack.c.l.b16 %v857_v54  ;;  %v932_v26 = vunpack.c.l.b16 %v856_v24 }
 0x15d   : > { %v3053_v56 = vpack.c.b16 %v957_v55, %v957_v55  ;;  %v3072_v29 = vpack.c.b16 %v932_v26, %v932_v26 }
 0x15f   : > { %959 = vrot.lane.b32.xlu0 %v3053_v56, %s2837_s3  ;;  %2524 = vmatmul.msk.bf16.vlgmr.msrb.gmra.mxu0 %vm863_vm2, %v1211_v50 }
 0x1ad   : > { %v1028_v62 = vpop.f32.mrf.mxu1 }
 0x1ae   : > { %v1029_v63 = vadd.f32 %v1028_v62, %v755_v61 }
 0x1b0   : > { %v1035_v0 = vsel %vm863_vm2, %v1029_v63, -inf }
 0x1b1   : > { %1036 = vmax.xlane.f32.xlu2 %v1035_v0 }
 0x1b2   : > { %v879_v2 = vpop.f32.mrf.mxu2 }
 0x1b3   : > { %v880_v4 = vadd.f32 %v879_v2, %v754_v1 }
 0x1b5   : > { %v1030_v7 = vpop.f32.mrf.mxu1  ;;  %v907_v8 = vsel %vm863_vm2, %v880_v4, -inf }
 0x1b6   : > { %908 = vmax.xlane.f32.xlu0 %v907_v8 }
 0x1ba   : > { %v881_v9 = vpop.f32.mrf.mxu2 }
 0x1bc   : > { %v1002_v11 = vpop.f32.mrf.mxu0 }
 0x1bd   : > { %v1003_v12 = vadd.f32 %v1002_v11, %v754_v1 }
 0x1bf   : > { %v1032_v13 = vsel %vm863_vm2, %v1003_v12, -inf }
 0x1c0   : > { %1033 = vmax.xlane.f32.xlu1 %v1032_v13 }
 0x1c2   : > { %v903_v14 = vpop.f32.mrf.mxu2 }
 0x1c3   : > { %v904_v15 = vadd.f32 %v903_v14, %v755_v61 }
 0x1c4   : > { %v1004_v16 = vpop.f32.mrf.mxu0  ;;  %v1140_v17 = vpop.f32.mrf.mxu1 }
 0x1c5   : > { %v910_v18 = vsel %vm863_vm2, %v904_v15, -inf  ;;  %v1141_v32 = vadd.f32 %v1140_v17, %v755_v61 }
 0x1c6   : > { %911 = vmax.xlane.f32.xlu2 %v910_v18 }
 0x1c7   : > { %v1147_v33 = vsel %vm863_vm2, %v1141_v32, -inf }
 0x1ca   : > { %v905_v19 = vpop.f32.mrf.mxu2 }
 0x1cc   : > { %v1117_v21 = vpop.f32.mrf.mxu0  ;;  %v1142_v22 = vpop.f32.mrf.mxu1 }
 0x1cd   : > { %v3068_v23 = vadd.f32 %v1117_v21, %v754_v1 }
 0x1cf   : > { %v1144_v25 = vsel %vm863_vm2, %v3068_v23, -inf }
 0x1d0   : > { %1145 = vmax.xlane.f32.xlu0 %v1144_v25 }
 0x1d1   : > { %v960_v38 = vpop.permute.xlu0 %959 }
 0x1d4   : > { %v1119_v27 = vpop.f32.mrf.mxu0  ;;  %v1252_v28 = vpop.f32.mrf.mxu1 }
 0x1d5   : > { %v3079_v34 = vadd.f32 %v1252_v28, %v755_v61 }
 0x1d7   : > { %v1259_v36 = vsel %vm863_vm2, %v3079_v34, -inf }
 0x1d9   : > { %934 = vrot.lane.b32.xlu1 %v3072_v29, %s2837_s3  ;;  %s2842_s3 = smov 8  }
 0x1dc   : > { %v1229_v30 = vpop.f32.mrf.mxu0  ;;  %v1254_v31 = vpop.f32.mrf.mxu1 }
 0x1dd   : > { %v3081_v35 = vadd.f32 %v1229_v30, %v754_v1  ;;  %v965_v1 = vsel %vm939_vm5, %v960_v38, 0 }
 0x1de   : > { %1056 = vrot.lane.b32.xlu2 %v3072_v29, %s2839_s18 }
 0x1df   : > { %v1256_v37 = vsel %vm863_vm2, %v3081_v35, -inf }
 0x1e4   : > { %v1231_v10 = vpop.f32.mrf.mxu0  ;;  %1077 = vrot.lane.b32.xlu0 %v3053_v56, %s2839_s18  ;;  %s3405_s18 = sld [smem:[#allocation6_spill]] }
 0x207   : > { %1148 = vmax.xlane.f32.xlu2 %v1147_v33 }
 0x20e   : > { %1260 = vmax.xlane.f32.xlu0 %v1259_v36 }
 0x20f   : > { %1257 = vmax.xlane.f32.xlu2 %v1256_v37 }
 0x224   : > { %v1037_v39 = vpop.xlane.xlu2 %1036 }
 0x225   : > { %v1039_v40 = vsub.f32 %v1029_v63, %v1037_v39 }
 0x227   : > { %v1042_v41 = vmul.f32 1.442695, %v1039_v40 }
 0x229   : > { %2727 = vpow2.f32 %v1042_v41  ;;  %v909_v42 = vpop.xlane.xlu0 %908 }
 0x22a   : > { %v913_v43 = vsub.f32 %v880_v4, %v909_v42 }
 0x22c   : > { %v915_v44 = vmul.f32 1.442695, %v913_v43 }
 0x22e   : > { %2729 = vpow2.f32 %v915_v44 }
 0x22f   : > { %v3087_v45 = vpop.eup %2727 }
 0x230   : > { %v1047_v46 = vsel %vm863_vm2, %v3087_v45, 0.0 }
 0x231   : > { %1048 = vadd.xlane.f32.xlu1 %v1047_v46 }
 0x233   : > { %v1034_v47 = vpop.xlane.xlu1 %1033 }
 0x234   : > { %v3091_v48 = vpop.eup %2729  ;;  %v1038_v49 = vsub.f32 %v1003_v12, %v1034_v47 }
 0x235   : > { %v919_v50 = vsel %vm863_vm2, %v3091_v48, 0.0 }
 0x236   : > { %v1040_v51 = vmul.f32 1.442695, %v1038_v49  ;;  %920 = vadd.xlane.f32.xlu0 %v919_v50 }
 0x238   : > { %2731 = vpow2.f32 %v1040_v51 }
 0x239   : > { %v912_v52 = vpop.xlane.xlu2 %911 }
 0x23a   : > { %v914_v53 = vsub.f32 %v904_v15, %v912_v52 }
 0x23c   : > { %v917_v54 = vmul.f32 1.442695, %v914_v53 }
 0x23e   : > { %v3095_v55 = vpop.eup %2731  ;;  %2733 = vpow2.f32 %v917_v54 }
 0x23f   : > { %v1044_v57 = vsel %vm863_vm2, %v3095_v55, 0.0 }
 0x240   : > { %1045 = vadd.xlane.f32.xlu2 %v1044_v57 }
 0x241   : > { %v1057_v58 = vpop.permute.xlu2 %1056 }
 0x242   : > { %v1062_v59 = vsel %vm939_vm5, %v1057_v58, 0 }
 0x243   : > { %1071 = vmatpush.bf16.msra.mxu2 %v1062_v59  ;;  %v1146_v2 = vpop.xlane.xlu0 %1145 }
 0x244   : > { %v3100_v61 = vpop.eup %2733  ;;  %v1150_v4 = vsub.f32 %v3068_v23, %v1146_v2 }
 0x245   : > { %v922_v62 = vsel %vm863_vm2, %v3100_v61, 0.0 }
 0x246   : > { %v1152_v7 = vmul.f32 1.442695, %v1150_v4 }
 0x248   : > { %923 = vadd.xlane.f32.xlu2 %v922_v62  ;;  %2735 = vpow2.f32 %v1152_v7 }
 0x24a   : > { %1168 = vrot.lane.b32.xlu1 %v3072_v29, %s2840_s5  ;;  %1189 = vrot.lane.b32.xlu0 %v3053_v56, %s2840_s5 }
 0x24b   : > { %v935_v63 = vpop.permute.xlu1 %934 }
 0x24c   : > { %v941_v0 = vsel %vm939_vm5, %v935_v63, 0 }
 0x24d   : > { %950 = vmatpush.bf16.msra.mxu3 %v941_v0 }
 0x24e   : > { %v3109_v8 = vpop.eup %2735 }
 0x24f   : > { %v1156_v9 = vsel %vm863_vm2, %v3109_v8, 0.0 }
 0x251   : > { %974 = vmatpush.bf16.msrb.mxu3 %v965_v1 }
 0x256   : > { %v1078_v11 = vpop.permute.xlu0 %1077 }
 0x274   : > { %1157 = vadd.xlane.f32.xlu0 %v1156_v9 }
 0x27a   : > { %v1149_v12 = vpop.xlane.xlu2 %1148 }
 0x27b   : > { %v1151_v13 = vsub.f32 %v1141_v32, %v1149_v12  ;;  %v1083_v32 = vsel %vm939_vm5, %v1078_v11, 0 }
 0x27d   : > { %v1154_v14 = vmul.f32 1.442695, %v1151_v13 }
 0x27f   : > { %2737 = vpow2.f32 %v1154_v14 }
 0x281   : > { %v1261_v15 = vpop.xlane.xlu0 %1260 }
 0x282   : > { %v1263_v16 = vsub.f32 %v3079_v34, %v1261_v15  ;;  %v1258_v17 = vpop.xlane.xlu2 %1257 }
 0x283   : > { %v1262_v18 = vsub.f32 %v3081_v35, %v1258_v17 }
 0x284   : > { %v1266_v19 = vmul.f32 1.442695, %v1263_v16 }
 0x285   : > { %v2738_v20 = vpop.eup %2737  ;;  %v1264_v21 = vmul.f32 1.442695, %v1262_v18 }
 0x286   : > { %2739 = vpow2.f32 %v1266_v19  ;;  %v1159_v22 = vsel %vm863_vm2, %v2738_v20, 0.0 }
 0x287   : > { %2741 = vpow2.f32 %v1264_v21  ;;  %1160 = vadd.xlane.f32.xlu2 %v1159_v22 }
 0x288   : > { %1301 = vrot.lane.b32.xlu0 %v3053_v56, %s2841_s21 }
 0x28c   : > { %v3117_v23 = vpop.eup %2739 }
 0x28d   : > { %v2742_v24 = vpop.eup %2741  ;;  %v1271_v25 = vsel %vm863_vm2, %v3117_v23, 0.0 }
 0x28e   : > { %v1268_v26 = vsel %vm863_vm2, %v2742_v24, 0.0 }
 0x28f   : > { %1272 = vadd.xlane.f32.xlu2 %v1271_v25  ;;  %1269 = vadd.xlane.f32.xlu1 %v1268_v26 }
 0x2a4   : > { %v1049_v56 = vpop.xlane.xlu1 %1048 }
 0x2a7   : > { %1280 = vrot.lane.b32.xlu2 %v3072_v29, %s2841_s21 }
 0x2a9   : > { %v921_v27 = vpop.xlane.xlu0 %920 }
 0x2aa   : > { %2743 = vrcp.f32 %v921_v27  ;;  %v2632_v27 = vld [vmem:[%s2953_s25 + $0x8] sm:$0xff] }
 0x2ab   : > { %1377 = vmatpush.bf16.msra.mxu0 %v2632_v27 }
 0x2b0   : > { %v2744_v28 = vpop.eup %2743 }
 0x2b1   : > { %v927_v30 = vmul.f32 %v2744_v28, %v3091_v48  ;;  %v2631_v28 = vld [vmem:[%s2953_s25] sm:$0xff] }
 0x2b2   : > { %1378 = vmatpush.bf16.msra.mxu0 %v2631_v28 }
 0x2b3   : > { %v1046_v31 = vpop.xlane.xlu2 %1045  ;;  %v929_v10 = vpack.c.bf16 %v927_v30, %v927_v30 }
 0x2b4   : > { %2745 = vrcp.f32 %v1046_v31 }
 0x2b5   : > { %2514 = vmatmul.msk.bf16.vlgmr.msra.gmra.mxu3 %vm863_vm2, %v929_v10 }
 0x2b6   : > { %1092 = vmatpush.bf16.msra.mxu3 %v1083_v32 }
 0x2ba   : > { %v2746_v33 = vpop.eup %2745 }
 0x2bb   : > { %v1052_v34 = vmul.f32 %v2746_v33, %v3095_v55  ;;  %v924_v35 = vpop.xlane.xlu2 %923 }
 0x2bc   : > { %v1169_v36 = vpop.permute.xlu1 %1168  ;;  %2747 = vrcp.f32 %v924_v35  ;;  %v1190_v40 = vpop.permute.xlu0 %1189 }
 0x2bd   : > { %v1054_v29 = vpack.c.bf16 %v1052_v34, %v1052_v34  ;;  %v1174_v37 = vsel %vm939_vm5, %v1169_v36, 0  ;;  %v1195_v42 = vsel %vm939_vm5, %v1190_v40, 0  ;;  %2749 = vrcp.f32 %v1049_v56 }
 0x2be   : > { %1183 = vmatpush.bf16.msrb.mxu2 %v1174_v37 }
 0x2bf   : > { %2518 = vmatmul.msk.bf16.vlgmr.msra.gmra.mxu2 %vm863_vm2, %v1054_v29 }
 0x2c2   : > { %v2748_v38 = vpop.eup %2747 }
 0x2c3   : > { %v928_v39 = vmul.f32 %v2748_v38, %v3100_v61  ;;  %v2750_v43 = vpop.eup %2749 }
 0x2c4   : > { %v1053_v44 = vmul.f32 %v2750_v43, %v3087_v45  ;;  %v1355_v43 = vperm.slane %v3001_v3, 3 }
 0x2c5   : > { %v930_v41 = vpack.c.bf16 %v928_v39, %v928_v39 }
 0x2c6   : > { %v1055_v46 = vpack.c.bf16 %v1053_v44, %v1053_v44 }
 0x2c7   : > { %2515 = vmatmul.msk.bf16.vlgmr.msrb.gmra.mxu3 %vm863_vm2, %v930_v41 }
 0x2c8   : > { %1204 = vmatpush.bf16.msrb.mxu3 %v1195_v42 }
 0x2d7   : > { %2519 = vmatmul.msk.bf16.vlgmr.msra.gmra.mxu3 %vm863_vm2, %v1055_v46 }
 0x2e7   : > { %v1158_v47 = vpop.xlane.xlu0 %1157 }
 0x2e8   : > { %2751 = vrcp.f32 %v1158_v47 }
 0x2ee   : > { %v2752_v48 = vpop.eup %2751 }
 0x2ef   : > { %v1164_v49 = vmul.f32 %v2752_v48, %v3109_v8 }
 0x2f1   : > { %v1166_v50 = vpack.c.bf16 %v1164_v49, %v1164_v49 }
 0x2f3   : > { %2522 = vmatmul.msk.bf16.vlgmr.msrb.gmra.mxu2 %vm863_vm2, %v1166_v50 }
 0x2fa   : > { %v1302_v51 = vpop.permute.xlu0 %1301  ;;  %v1161_v52 = vpop.xlane.xlu2 %1160 }
 0x2fb   : > { %v1307_v53 = vsel %vm939_vm5, %v1302_v51, 0  ;;  %2753 = vrcp.f32 %v1161_v52 }
 0x2fc   : > { %1316 = vmatpush.bf16.msra.mxu3 %v1307_v53  ;;  %v2845_v53 = vmov 32.0  }
 0x301   : > { %v2754_v54 = vpop.eup %2753 }
 0x302   : > { %v1165_v55 = vmul.f32 %v2754_v54, %v2738_v20  ;;  %v1270_v45 = vpop.xlane.xlu1 %1269  ;;  %v1273_v57 = vpop.xlane.xlu2 %1272 }
 0x303   : > { %2755 = vrcp.f32 %v1270_v45  ;;  %v2634_v45 = vld [vmem:[%s2961_s15 + $0x8] sm:$0xff] }
 0x304   : > { %v1167_v58 = vpack.c.bf16 %v1165_v55, %v1165_v55  ;;  %2757 = vrcp.f32 %v1273_v57  ;;  %1467 = vmatpush.bf16.msrb.mxu1 %v2634_v45 }
 0x305   : > { %2759 = vrcp.f32 %v2845_v53 }
 0x306   : > { %2523 = vmatmul.msk.bf16.vlgmr.msrb.gmra.mxu3 %vm863_vm2, %v1167_v58 }
 0x309   : > { %v2756_v59 = vpop.eup %2755 }
 0x30a   : > { %v1276_v61 = vmul.f32 %v2756_v59, %v2742_v24  ;;  %v1281_v62 = vpop.permute.xlu2 %1280  ;;  %v2758_v1 = vpop.eup %2757 }
 0x30b   : > { %v1286_v63 = vsel %vm939_vm5, %v1281_v62, 0  ;;  %v1277_v2 = vmul.f32 %v2758_v1, %v3117_v23  ;;  %v2760_v54 = vpop.eup %2759 }
 0x30c   : > { %v1278_v0 = vpack.c.bf16 %v1276_v61, %v1276_v61  ;;  %1295 = vmatpush.bf16.msra.mxu2 %v1286_v63  ;;  %v1394_v55 = vmul.f32 32.0, %v2760_v54  ;;  %vm1398_vm8 = vweird.f32 %v2760_v54 }
 0x30d   : > { %v1279_v4 = vpack.c.bf16 %v1277_v2, %v1277_v2 }
 0x30e   : > { %v1395_v57 = vsub.f32 1.0, %v1394_v55 }
 0x30f   : > { %2526 = vmatmul.msk.bf16.vlgmr.msra.gmra.mxu2 %vm863_vm2, %v1278_v0 }
 0x310   : > { %v1396_v58 = vmul.f32 %v2760_v54, %v1395_v57 }
 0x316   : > { %2527 = vmatmul.msk.bf16.vlgmr.msra.gmra.mxu3 %vm863_vm2, %v1279_v4  ;;  %v2633_v4 = vld [vmem:[%s2961_s15] sm:$0xff] }
 0x317   : > { %1468 = vmatpush.bf16.msrb.mxu1 %v2633_v4 }
 0x338   : > { %v952_v7 = vpop.f32.mrf.mxu3 }
 0x340   : > { %v954_v8 = vpop.f32.mrf.mxu3 }
 0x342   : > { %v1073_v9 = vpop.f32.mrf.mxu2 }
 0x34a   : > { %v976_v11 = vpop.f32.mrf.mxu3  ;;  %v1075_v12 = vpop.f32.mrf.mxu2 }
 0x352   : > { %v978_v13 = vpop.f32.mrf.mxu3 }
 0x35a   : > { %v1094_v14 = vpop.f32.mrf.mxu3 }
 0x35b   : > { %v2696_v15 = vpack.i.bf16 %v1094_v14, %v1073_v9 }
 0x35d   : > { %2697 = vrot.lane.b32.xlu0 %v2696_v15, %s2842_s3 }
 0x362   : > { %v1096_v16 = vpop.f32.mrf.mxu3 }
 0x376   : > { %v1185_v17 = vpop.f32.mrf.mxu2 }
 0x37e   : > { %v1187_v18 = vpop.f32.mrf.mxu2 }
 0x389   : > { %v1206_v19 = vpop.f32.mrf.mxu3 }
 0x38a   : > { %v2701_v20 = vpack.i.bf16 %v1206_v19, %v1185_v17 }
 0x38c   : > { %2702 = vrot.lane.b32.xlu0 %v2701_v20, %s2843_s20 }
 0x391   : > { %v1208_v21 = vpop.f32.mrf.mxu3 }
 0x392   : > { %v1297_v22 = vpop.f32.mrf.mxu2 }
 0x399   : > { %v1318_v23 = vpop.f32.mrf.mxu3 }
 0x39a   : > { %v2706_v24 = vpack.i.bf16 %v1318_v23, %v1297_v22  ;;  %v1299_v25 = vpop.f32.mrf.mxu2 }
 0x39c   : > { %2707 = vrot.lane.b32.xlu2 %v2706_v24, %s2844_s4 }
 0x3a1   : > { %v1320_v26 = vpop.f32.mrf.mxu3 }
 0x3cf   : > { %v2698_v30 = vpop.permute.xlu0 %2697 }
 0x3d0   : > { %v2700_v31 = vunpack.i.h.bf16 %v2698_v30  ;;  %v2699_v10 = vunpack.i.l.bf16 %v2698_v30  ;;  %v1438_v30 = vperm.slane %v3001_v3, 4 }
 0x3d2   : > { %v1347_v35 = vsel %vm863_vm2, %v976_v11, %v2700_v31  ;;  %v1346_v36 = vsel %vm863_vm2, %v952_v7, %v2699_v10 }
 0x3f6   : > { %v2708_v56 = vpop.permute.xlu2 %2707 }
 0x3f7   : > { %v2710_v29 = vunpack.i.h.bf16 %v2708_v56  ;;  %v2709_v37 = vunpack.i.l.bf16 %v2708_v56 }
 0x3fe   : > { %v2703_v32 = vpop.permute.xlu0 %2702 }
 0x3ff   : > { %v2705_v33 = vunpack.i.h.bf16 %v2703_v32  ;;  %v2704_v34 = vunpack.i.l.bf16 %v2703_v32  ;;  %v1441_v32 = vperm.slane %v3001_v3, 5  ;;  %v3185_v3 = vld [vmem:[%s2971_s23] sm:$0x3f] }
 0x401   : > { %v1350_v38 = vsel %vm1348_vm6, %v1347_v35, %v2705_v33  ;;  %v1349_v39 = vsel %vm1348_vm6, %v1346_v36, %v2704_v34 }
 0x402   : > { %v1352_v40 = vsel %vm1351_vm7, %v1349_v39, %v2709_v37  ;;  %v1353_v41 = vsel %vm1351_vm7, %v1350_v38, %v2710_v29  ;;  %v2628_v39 = vld [vmem:[%s3405_s18] sm:$0xff] }
 0x403   : > { %v1354_v42 = vpack.c.bf16 %v1353_v41, %v1352_v40  ;;  %v1503_v41 = vperm.slane %v3185_v3, 1 }
 0x405   : > { %2536 = vmatmul.msk.bf16.vlgmr.msra.gmra.mxu0 %vm817_vm1, %v1354_v42 }
 0x482   : > { %v1380_v44 = vpop.f32.mrf.mxu0 }
 0x483   : > { %v1381_v46 = vadd.f32 %v1380_v44, %v1355_v43 }
 0x485   : > { %v1385_v47 = vadd.f32 %v1381_v46, %v3003_v5  ;;  %v1397_v5 = vadd.f32 %v2760_v54, %v1396_v58 }
 0x487   : > { %v1387_v48 = vsel %vm817_vm1, %v1385_v47, 0.0  ;;  %v3160_v59 = vsel %vm1398_vm8, %v2760_v54, %v1397_v5 }
 0x488   : > { %1388 = vadd.xlane.f32.xlu0 %v1387_v48 }
 0x48a   : > { %v1382_v49 = vpop.f32.mrf.mxu0 }
 0x48b   : > { %v1383_v50 = vadd.f32 %v1382_v49, %v1355_v43  ;;  %v1445_v43 = vperm.slane %v3185_v3, 0 }
 0x48d   : > { %v1386_v51 = vadd.f32 %v1383_v50, %v3005_v6 }
 0x48f   : > { %v1390_v52 = vsel %vm817_vm1, %v1386_v51, 0.0 }
 0x490   : > { %1391 = vadd.xlane.f32.xlu1 %v1390_v52 }
 0x49c   : > { %1480 = vrot.lane.b32.xlu0 %v2633_v4, %s2830_s7 }
 0x4fb   : > { %v1389_v61 = vpop.xlane.xlu0 %1388 }
 0x4fc   : > { %v1400_v62 = vmul.f32 %v3160_v59, %v1389_v61 }
 0x4fe   : > { %v1402_v6 = vsub.f32 %v1385_v47, %v1400_v62 }
 0x500   : > { %v1404_v63 = vmul.f32 %v1402_v6, %v1402_v6 }
 0x502   : > { %v1406_v0 = vsel %vm817_vm1, %v1404_v63, 0.0 }
 0x503   : > { %v1392_v1 = vpop.xlane.xlu1 %1391  ;;  %1407 = vadd.xlane.f32.xlu2 %v1406_v0 }
 0x504   : > { %v1401_v2 = vmul.f32 %v3160_v59, %v1392_v1 }
 0x506   : > { %v1403_v7 = vsub.f32 %v1386_v51, %v1401_v2  ;;  %v1506_v2 = vperm.slane %v3185_v3, 2 }
 0x508   : > { %v1405_v8 = vmul.f32 %v1403_v7, %v1403_v7 }
 0x50a   : > { %v1409_v9 = vsel %vm817_vm1, %v1405_v8, 0.0 }
 0x50b   : > { %1410 = vadd.xlane.f32.xlu1 %v1409_v9 }
 0x50e   : > { %v1481_v29 = vpop.permute.xlu0 %1480 }
 0x524   : > { %1482 = vrot.lane.b32.xlu1 %v2634_v45, %s2830_s7 }
 0x576   : > { %v1408_v11 = vpop.xlane.xlu2 %1407 }
 0x577   : > { %v1412_v12 = vmul.f32 %v1408_v11, %v3160_v59 }
 0x579   : > { %v1414_v13 = vadd.f32 1e-05, %v1412_v12 }
 0x57b   : > { %2761 = vrsqrt.f32 %v1414_v13  ;;  %vm1422_vm10 = vweird.f32 %v1414_v13 }
 0x57e   : > { %v1411_v14 = vpop.xlane.xlu1 %1410 }
 0x57f   : > { %v1413_v15 = vmul.f32 %v1411_v14, %v3160_v59 }
 0x581   : > { %v2762_v16 = vpop.eup %2761  ;;  %v1415_v17 = vadd.f32 1e-05, %v1413_v15 }
 0x582   : > { %v1417_v18 = vmul.f32 %v2762_v16, %v1414_v13  ;;  %vm1423_vm9 = vweird.f32 %v2762_v16 }
 0x583   : > { %2763 = vrsqrt.f32 %v1415_v17  ;;  %vm1424_vm11 = vmor %vm1422_vm10, %vm1423_vm9  ;;  %vm1432_vm13 = vweird.f32 %v1415_v17 }
 0x584   : > { %v1418_v19 = vmul.f32 %v2762_v16, %v1417_v18 }
 0x586   : > { %v1419_v20 = vmul.f32 0.5, %v1418_v19 }
 0x588   : > { %v1420_v21 = vsub.f32 1.5, %v1419_v20 }
 0x589   : > { %v2764_v22 = vpop.eup %2763 }
 0x58a   : > { %v1421_v23 = vmul.f32 %v2762_v16, %v1420_v21  ;;  %v1427_v24 = vmul.f32 %v2764_v22, %v1415_v17  ;;  %vm1433_vm12 = vweird.f32 %v2764_v22 }
 0x58b   : > { %vm1434_vm14 = vmor %vm1432_vm13, %vm1433_vm12 }
 0x58c   : > { %v1428_v25 = vmul.f32 %v2764_v22, %v1427_v24  ;;  %v1425_v26 = vsel %vm1424_vm11, %v2762_v16, %v1421_v23 }
 0x58d   : > { %v1436_v31 = vmul.f32 %v1425_v26, %v1402_v6 }
 0x58e   : > { %v1429_v27 = vmul.f32 0.5, %v1428_v25 }
 0x58f   : > { %v1439_v33 = vmul.f32 %v1438_v30, %v1436_v31 }
 0x590   : > { %v1430_v28 = vsub.f32 1.5, %v1429_v27 }
 0x591   : > { %v3173_v37 = vadd.f32 %v1441_v32, %v1439_v33 }
 0x592   : > { %v1431_v10 = vmul.f32 %v2764_v22, %v1430_v28 }
 0x594   : > { %v1435_v56 = vsel %vm1434_vm14, %v2764_v22, %v1431_v10 }
 0x595   : > { %v1437_v34 = vmul.f32 %v1435_v56, %v1403_v7 }
 0x596   : > { %v1483_v35 = vpop.permute.xlu1 %1482 }
 0x597   : > { %v1440_v36 = vmul.f32 %v1438_v30, %v1437_v34  ;;  %1495 = vmatpush.bf16.msrb.mxu2 %v1483_v35 }
 0x599   : > { %v3175_v38 = vadd.f32 %v1441_v32, %v1440_v36 }
 0x59b   : > { %1496 = vmatpush.bf16.msrb.mxu2 %v1481_v29  ;;  %v1444_v40 = vpack.c.bf16 %v3175_v38, %v3173_v37 }
 0x59d   : > { %2545 = vmatmul.msk.bf16.vlgmr.msrb.gmra.mxu1 %vm817_vm1, %v1444_v40 }
 0x59e   : > { %2550 = vmatmul.msk.bf16.vlgmr.msrb.gmra.mxu2 %vm817_vm1, %v2628_v39 }
 0x61a   : > { %v1470_v42 = vpop.f32.mrf.mxu1 }
 0x61b   : > { %v1471_v47 = vadd.f32 %v1470_v42, %v1445_v43 }
 0x61d   : > { %v1513_v51 = vpack.c.bf16 %v1471_v47, %v1471_v47 }
 0x61f   : > { %v1630_v45 = vunpack.c.l.b16 %v1513_v51 }
 0x621   : > { %v3189_v44 = vpop.f32.mrf.mxu2  ;;  %v1631_v62 = vpack.c.b16 %v1630_v45, %v1630_v45 }
 0x622   : > { %v1504_v46 = vadd.f32 %v1503_v41, %v3189_v44  ;;  %v1472_v53 = vpop.f32.mrf.mxu1 }
 0x623   : > { %v1473_v57 = vadd.f32 %v1472_v53, %v1445_v43 }
 0x624   : > { %v1515_v48 = vpack.c.bf16 %v1504_v46, %v1504_v46 }
 0x625   : > { %v1514_v6 = vpack.c.bf16 %v1473_v57, %v1473_v57 }
 0x626   : > { %v1635_v49 = vunpack.c.l.b16 %v1515_v48  ;;  %v1523_v50 = vsel %vm863_vm2, %v1515_v48, 0 }
 0x627   : > { %1532 = vmatpush.bf16.xpose.msrb.mxu3 %v1523_v50  ;;  %v1659_v0 = vunpack.c.l.b16 %v1514_v6 }
 0x628   : > { %v1636_v52 = vpack.c.b16 %v1635_v49, %v1635_v49 }
 0x629   : > { %v3193_v54 = vpop.f32.mrf.mxu2  ;;  %v1660_v1 = vpack.c.b16 %v1659_v0, %v1659_v0 }
 0x62a   : > { %v1505_v55 = vadd.f32 %v1503_v41, %v3193_v54  ;;  %1755 = vrot.lane.b32.xlu0 %v1636_v52, %s2833_s28  ;;  %1637 = vrot.lane.b32.xlu1 %v1636_v52, %s2832_s22 }
 0x62c   : > { %v1516_v58 = vpack.c.bf16 %v1505_v55, %v1505_v55 }
 0x62e   : > { %v1664_v5 = vunpack.c.l.b16 %v1516_v58  ;;  %2551 = vmatmul.msk.bf16.vlgmr.msrb.gmra.mxu3 %vm863_vm2, %v1513_v51  ;;  %v1542_v61 = vsel %vm863_vm2, %v1516_v58, 0 }
 0x62f   : > { %1551 = vmatpush.bf16.xpose.msrb.mxu0 %v1542_v61 }
 0x630   : > { %v1665_v63 = vpack.c.b16 %v1664_v5, %v1664_v5 }
 0x632   : > { %1753 = vrot.lane.b32.xlu0 %v1631_v62, %s2833_s28  ;;  %1632 = vrot.lane.b32.xlu1 %v1631_v62, %s2832_s22 }
 0x633   : > { %1666 = vrot.lane.b32.xlu2 %v1665_v63, %s2832_s22 }
 0x636   : > { %2552 = vmatmul.msk.bf16.vlgmr.msrb.gmra.mxu0 %vm863_vm2, %v1514_v6 }
 0x63a   : > { %1661 = vrot.lane.b32.xlu1 %v1660_v1, %s2832_s22  ;;  %1890 = vrot.lane.b32.xlu0 %v1665_v63, %s2836_s16 }
 0x63b   : > { %1865 = vrot.lane.b32.xlu2 %v1631_v62, %s2836_s16 }
 0x642   : > { %1778 = vrot.lane.b32.xlu1 %v1665_v63, %s2833_s28 }
 0x643   : > { %1776 = vrot.lane.b32.xlu2 %v1660_v1, %s2833_s28  ;;  %s3406_s28 = sld [smem:[#allocation7_spill]] }
 0x649   : > { %v2652_v14 = vld [vmem:[%s3406_s28] sm:$0xff]  }
 0x64a   : > { %1867 = vrot.lane.b32.xlu1 %v1636_v52, %s2836_s16  ;;  %v2653_v15 = vunpack.c.l.bf16 %v2652_v14  ;;  %v2654_v17 = vunpack.c.h.bf16 %v2652_v14 }
 0x64c   : > { %vm760_vm15 = vcmp.gt.f32.partialorder %v2653_v15, 0.0  ;;  %vm761_vm0 = vcmp.gt.f32.partialorder %v2654_v17, 0.0 }
 0x64d   : > { %v3222_v19 = vsel %vm760_vm15, 0.0, %v2838_v60  ;;  %v3225_v21 = vsel %vm761_vm0, 0.0, %v2838_v60 }
 0x652   : > { %1888 = vrot.lane.b32.xlu1 %v1660_v1, %s2836_s16 }
 0x65a   : > { %1508 = vrot.lane.b32.xlu1 %v1506_v2, %s2829_s6 }
 0x68d   : > { %v1667_v4 = vpop.permute.xlu2 %1666 }
 0x68e   : > { %v1672_v7 = vsel %vm863_vm2, %v1667_v4, 0 }
 0x68f   : > { %1681 = vmatpush.bf16.xpose.msra.mxu0 %v1672_v7 }
 0x695   : > { %v1866_v22 = vpop.permute.xlu2 %1865 }
 0x69c   : > { %v1756_v8 = vpop.permute.xlu0 %1755  ;;  %v1638_v9 = vpop.permute.xlu1 %1637 }
 0x69d   : > { %v1761_v11 = vsel %vm863_vm2, %v1756_v8, 0  ;;  %v1643_v12 = vsel %vm863_vm2, %v1638_v9, 0  ;;  %v1777_v32 = vpop.permute.xlu2 %1776 }
 0x69e   : > { %1652 = vmatpush.bf16.xpose.msra.mxu3 %v1643_v12 }
 0x6a4   : > { %v1633_v13 = vpop.permute.xlu1 %1632  ;;  %v1754_v16 = vpop.permute.xlu0 %1753 }
 0x6a5   : > { %2555 = vmatmul.msk.bf16.vlgmr.msra.gmra.mxu3 %vm863_vm2, %v1633_v13 }
 0x6a6   : > { %1770 = vmatpush.bf16.xpose.msrb.mxu3 %v1761_v11 }
 0x6ac   : > { %v1662_v18 = vpop.permute.xlu1 %1661  ;;  %v1891_v24 = vpop.permute.xlu0 %1890 }
 0x6ad   : > { %2556 = vmatmul.msk.bf16.vlgmr.msra.gmra.mxu0 %vm863_vm2, %v1662_v18  ;;  %v1896_v31 = vsel %vm863_vm2, %v1891_v24, 0 }
 0x6b1   : > { %v1534_v20 = vpop.f32.mrf.mxu3 }
 0x6b2   : > { %v1535_v23 = vadd.f32 %v1534_v20, %v3222_v19 }
 0x6b3   : > { %v1553_v25 = vpop.f32.mrf.mxu0 }
 0x6b4   : > { %v1554_v26 = vadd.f32 %v1553_v25, %v3225_v21  ;;  %v1779_v27 = vpop.permute.xlu1 %1778  ;;  %v1557_v28 = vsel %vm863_vm2, %v1535_v23, -inf }
 0x6b5   : > { %v1784_v30 = vsel %vm863_vm2, %v1779_v27, 0  ;;  %2559 = vmatmul.msk.bf16.vlgmr.msrb.gmra.mxu3 %vm863_vm2, %v1754_v16  ;;  %1558 = vmax.xlane.f32.xlu2 %v1557_v28 }
 0x6b6   : > { %1793 = vmatpush.bf16.xpose.msrb.mxu0 %v1784_v30  ;;  %v1560_v60 = vsel %vm863_vm2, %v1554_v26, -inf }
 0x6b7   : > { %1561 = vmax.xlane.f32.xlu0 %v1560_v60 }
 0x6b9   : > { %v1536_v10 = vpop.f32.mrf.mxu3 }
 0x6bb   : > { %v1555_v56 = vpop.f32.mrf.mxu0 }
 0x6bc   : > { %v1868_v33 = vpop.permute.xlu1 %1867 }
 0x6bd   : > { %v1873_v34 = vsel %vm863_vm2, %v1868_v33, 0  ;;  %2560 = vmatmul.msk.bf16.vlgmr.msrb.gmra.mxu0 %vm863_vm2, %v1777_v32 }
 0x6be   : > { %1905 = vmatpush.bf16.xpose.msra.mxu0 %v1896_v31  ;;  %1882 = vmatpush.bf16.xpose.msra.mxu3 %v1873_v34 }
 0x6c4   : > { %v1889_v35 = vpop.permute.xlu1 %1888 }
 0x6c5   : > { %2563 = vmatmul.msk.bf16.vlgmr.msra.gmra.mxu3 %vm863_vm2, %v1866_v22 }
 0x6cc   : > { %v1509_v51 = vpop.permute.xlu1 %1508 }
 0x6cd   : > { %2564 = vmatmul.msk.bf16.vlgmr.msra.gmra.mxu0 %vm863_vm2, %v1889_v35  ;;  %v1511_v53 = vadd.f32 %v1509_v51, %v3189_v44  ;;  %v1512_v1 = vadd.f32 %v1509_v51, %v3193_v54 }
 0x6cf   : > { %v1517_v5 = vpack.c.bf16 %v1511_v53, %v1511_v53  ;;  %v1518_v4 = vpack.c.bf16 %v1512_v1, %v1512_v1 }
 0x6d1   : > { %v1582_v6 = vunpack.c.l.b16 %v1517_v5  ;;  %v1606_v7 = vunpack.c.l.b16 %v1518_v4 }
 0x6d3   : > { %v3248_v0 = vpack.c.b16 %v1582_v6, %v1582_v6  ;;  %v3253_v11 = vpack.c.b16 %v1606_v7, %v1606_v7 }
 0x728   : > { %v1654_v36 = vpop.f32.mrf.mxu3  ;;  %v1559_v29 = vpop.xlane.xlu2 %1558 }
 0x729   : > { %v1655_v39 = vadd.f32 %v1654_v36, %v3222_v19  ;;  %v1563_v40 = vsub.f32 %v1535_v23, %v1559_v29 }
 0x72a   : > { %v1683_v41 = vpop.f32.mrf.mxu0  ;;  %v1562_v42 = vpop.xlane.xlu0 %1561 }
 0x72b   : > { %v1565_v43 = vmul.f32 1.442695, %v1563_v40  ;;  %v3240_v46 = vadd.f32 %v1683_v41, %v3225_v21  ;;  %v1564_v47 = vsub.f32 %v1554_v26, %v1562_v42  ;;  %v1687_v48 = vsel %vm863_vm2, %v1655_v39, -inf }
 0x72c   : > { %1688 = vmax.xlane.f32.xlu0 %v1687_v48 }
 0x72d   : > { %2765 = vpow2.f32 %v1565_v43  ;;  %v1567_v49 = vmul.f32 1.442695, %v1564_v47  ;;  %v1690_v50 = vsel %vm863_vm2, %v3240_v46, -inf }
 0x72e   : > { %1691 = vmax.xlane.f32.xlu1 %v1690_v50 }
 0x72f   : > { %2767 = vpow2.f32 %v1567_v49 }
 0x730   : > { %v1656_v52 = vpop.f32.mrf.mxu3 }
 0x732   : > { %v1685_v55 = vpop.f32.mrf.mxu0 }
 0x733   : > { %v2766_v45 = vpop.eup %2765 }
 0x734   : > { %v1569_v57 = vsel %vm863_vm2, %v2766_v45, 0.0 }
 0x735   : > { %v2768_v58 = vpop.eup %2767  ;;  %1570 = vadd.xlane.f32.xlu2 %v1569_v57 }
 0x736   : > { %v1572_v61 = vsel %vm863_vm2, %v2768_v58, 0.0 }
 0x737   : > { %1573 = vadd.xlane.f32.xlu1 %v1572_v61 }
 0x738   : > { %v1772_v62 = vpop.f32.mrf.mxu3 }
 0x739   : > { %v1773_v54 = vadd.f32 %v1772_v62, %v3222_v19 }
 0x73a   : > { %v1795_v63 = vpop.f32.mrf.mxu0 }
 0x73b   : > { %v1799_v14 = vsel %vm863_vm2, %v1773_v54, -inf  ;;  %v1796_v16 = vadd.f32 %v1795_v63, %v3225_v21 }
 0x73d   : > { %v1802_v18 = vsel %vm863_vm2, %v1796_v16, -inf }
 0x740   : > { %v1774_v2 = vpop.f32.mrf.mxu3  ;;  %1584 = vrot.lane.b32.xlu0 %v3248_v0, %s2830_s7 }
 0x742   : > { %v1797_v44 = vpop.f32.mrf.mxu0 }
 0x748   : > { %v1884_v8 = vpop.f32.mrf.mxu3 }
 0x749   : > { %v1885_v15 = vadd.f32 %v1884_v8, %v3222_v19 }
 0x74a   : > { %v1907_v9 = vpop.f32.mrf.mxu0 }
 0x74b   : > { %v1911_v17 = vsel %vm863_vm2, %v1885_v15, -inf  ;;  %v1908_v27 = vadd.f32 %v1907_v9, %v3225_v21 }
 0x74d   : > { %1732 = vrot.lane.b32.xlu2 %v3253_v11, %s2831_s8  ;;  %v1914_v56 = vsel %vm863_vm2, %v1908_v27, -inf }
 0x750   : > { %v1886_v12 = vpop.f32.mrf.mxu3  ;;  %1608 = vrot.lane.b32.xlu1 %v3253_v11, %s2830_s7 }
 0x752   : > { %v1909_v13 = vpop.f32.mrf.mxu0 }
 0x76a   : > { %1800 = vmax.xlane.f32.xlu0 %v1799_v14 }
 0x772   : > { %1912 = vmax.xlane.f32.xlu0 %v1911_v17 }
 0x776   : > { %1803 = vmax.xlane.f32.xlu2 %v1802_v18 }
 0x786   : > { %1711 = vrot.lane.b32.xlu0 %v3248_v0, %s2831_s8 }
 0x78e   : > { %1844 = vrot.lane.b32.xlu2 %v3253_v11, %s2834_s24 }
 0x79f   : > { %v1689_v22 = vpop.xlane.xlu0 %1688 }
 0x7a0   : > { %v1693_v24 = vsub.f32 %v1655_v39, %v1689_v22 }
 0x7a1   : > { %v1692_v23 = vpop.xlane.xlu1 %1691 }
 0x7a2   : > { %v1695_v25 = vmul.f32 1.442695, %v1693_v24  ;;  %v1694_v31 = vsub.f32 %v3240_v46, %v1692_v23 }
 0x7a4   : > { %v1697_v32 = vmul.f32 1.442695, %v1694_v31 }
 0x7a8   : > { %v1571_v20 = vpop.xlane.xlu2 %1570 }
 0x7a9   : > { %2769 = vrcp.f32 %v1571_v20 }
 0x7aa   : > { %2771 = vpow2.f32 %v1695_v25  ;;  %v1574_v10 = vpop.xlane.xlu1 %1573 }
 0x7ab   : > { %2773 = vrcp.f32 %v1574_v10 }
 0x7ac   : > { %2775 = vpow2.f32 %v1697_v32 }
 0x7af   : > { %v2770_v19 = vpop.eup %2769 }
 0x7b0   : > { %v1577_v26 = vmul.f32 %v2770_v19, %v2766_v45  ;;  %v2772_v33 = vpop.eup %2771  ;;  %v1733_v36 = vpop.permute.xlu2 %1732 }
 0x7b1   : > { %v2774_v34 = vpop.eup %2773  ;;  %v1699_v21 = vsel %vm863_vm2, %v2772_v33, 0.0  ;;  %v1738_v41 = vsel %vm939_vm5, %v1733_v36, 0 }
 0x7b2   : > { %v1585_v28 = vpop.permute.xlu0 %1584  ;;  %v1579_v60 = vpack.c.bf16 %v1577_v26, %v1577_v26  ;;  %v1578_v35 = vmul.f32 %v2774_v34, %v2768_v58  ;;  %v2776_v39 = vpop.eup %2775 }
 0x7b3   : > { %v1590_v30 = vsel %vm939_vm5, %v1585_v28, 0  ;;  %v1702_v43 = vsel %vm863_vm2, %v2776_v39, 0.0 }
 0x7b4   : > { %1599 = vmatpush.bf16.msra.mxu1 %v1590_v30  ;;  %v1580_v42 = vpack.c.bf16 %v1578_v35, %v1578_v35 }
 0x7b7   : > { %1915 = vmax.xlane.f32.xlu2 %v1914_v56  ;;  %2553 = vmatmul.msk.bf16.vlgmr.msra.gmra.mxu1 %vm863_vm2, %v1579_v60 }
 0x7bf   : > { %1700 = vadd.xlane.f32.xlu2 %v1699_v21 }
 0x7c2   : > { %v1609_v29 = vpop.permute.xlu1 %1608 }
 0x7c3   : > { %v1614_v40 = vsel %vm939_vm5, %v1609_v29, 0 }
 0x7c4   : > { %1623 = vmatpush.bf16.msra.mxu2 %v1614_v40 }
 0x7c7   : > { %2554 = vmatmul.msk.bf16.vlgmr.msra.gmra.mxu2 %vm863_vm2, %v1580_v42  ;;  %1703 = vadd.xlane.f32.xlu2 %v1702_v43 }
 0x7c8   : > { %1747 = vmatpush.bf16.msrb.mxu2 %v1738_v41 }
 0x7dd   : > { %v1801_v46 = vpop.xlane.xlu0 %1800 }
 0x7de   : > { %v1805_v47 = vsub.f32 %v1773_v54, %v1801_v46 }
 0x7df   : > { %1823 = vrot.lane.b32.xlu2 %v3248_v0, %s2834_s24 }
 0x7e0   : > { %v1807_v48 = vmul.f32 1.442695, %v1805_v47 }
 0x7e2   : > { %2777 = vpow2.f32 %v1807_v48 }
 0x7e5   : > { %v1913_v50 = vpop.xlane.xlu0 %1912 }
 0x7e6   : > { %v1917_v55 = vsub.f32 %v1885_v15, %v1913_v50 }
 0x7e8   : > { %v2778_v49 = vpop.eup %2777  ;;  %v1919_v57 = vmul.f32 1.442695, %v1917_v55 }
 0x7e9   : > { %v1804_v51 = vpop.xlane.xlu2 %1803  ;;  %v1811_v52 = vsel %vm863_vm2, %v2778_v49, 0.0 }
 0x7ea   : > { %v1806_v53 = vsub.f32 %v1796_v16, %v1804_v51  ;;  %1812 = vadd.xlane.f32.xlu0 %v1811_v52 }
 0x7ec   : > { %v1809_v45 = vmul.f32 1.442695, %v1806_v53 }
 0x7ee   : > { %2779 = vpow2.f32 %v1809_v45 }
 0x7ef   : > { %2781 = vpow2.f32 %v1919_v57  ;;  %v2636_v57 = vld [vmem:[%s2966_s1 + $0x8] sm:$0xff] }
 0x7f0   : > { %2030 = vmatpush.bf16.msrb.mxu3 %v2636_v57 }
 0x7f1   : > { %v1845_v58 = vpop.permute.xlu2 %1844 }
 0x7f2   : > { %v1850_v5 = vsel %vm939_vm5, %v1845_v58, 0 }
 0x7f3   : > { %1859 = vmatpush.bf16.msra.mxu2 %v1850_v5 }
 0x7f4   : > { %v2780_v61 = vpop.eup %2779 }
 0x7f5   : > { %v1814_v62 = vsel %vm863_vm2, %v2780_v61, 0.0  ;;  %v2782_v1 = vpop.eup %2781 }
 0x7f6   : > { %1815 = vadd.xlane.f32.xlu1 %v1814_v62  ;;  %v1923_v2 = vsel %vm863_vm2, %v2782_v1, 0.0  ;;  %v2635_v62 = vld [vmem:[%s2966_s1] sm:$0xff] }
 0x7f7   : > { %2031 = vmatpush.bf16.msrb.mxu3 %v2635_v62 }
 0x7f8   : > { %v1712_v6 = vpop.permute.xlu0 %1711 }
 0x7f9   : > { %v1717_v63 = vsel %vm939_vm5, %v1712_v6, 0 }
 0x7fa   : > { %1726 = vmatpush.bf16.msrb.mxu1 %v1717_v63 }
 0x7fe   : > { %1956 = vrot.lane.b32.xlu0 %v3253_v11, %s2835_s27  ;;  %1924 = vadd.xlane.f32.xlu1 %v1923_v2 }
 0x817   : > { %1935 = vrot.lane.b32.xlu1 %v3248_v0, %s2835_s27 }
 0x82a   : > { %v1916_v44 = vpop.xlane.xlu2 %1915 }
 0x82b   : > { %v1918_v4 = vsub.f32 %v1908_v27, %v1916_v44 }
 0x82d   : > { %v1921_v7 = vmul.f32 1.442695, %v1918_v4 }
 0x82f   : > { %2783 = vpow2.f32 %v1921_v7 }
 0x832   : > { %v1701_v8 = vpop.xlane.xlu2 %1700 }
 0x833   : > { %2785 = vrcp.f32 %v1701_v8 }
 0x834   : > { %v3290_v9 = vpop.f32.mrf.mxu1 }
 0x835   : > { %v2784_v12 = vpop.eup %2783 }
 0x836   : > { %v1926_v13 = vsel %vm863_vm2, %v2784_v12, 0.0 }
 0x837   : > { %1927 = vadd.xlane.f32.xlu2 %v1926_v13 }
 0x839   : > { %v2786_v54 = vpop.eup %2785 }
 0x83a   : > { %v1707_v14 = vmul.f32 %v2786_v54, %v2772_v33  ;;  %v1704_v15 = vpop.xlane.xlu2 %1703 }
 0x83b   : > { %2787 = vrcp.f32 %v1704_v15 }
 0x83c   : > { %v1709_v11 = vpack.c.bf16 %v1707_v14, %v1707_v14  ;;  %v1603_v16 = vpop.f32.mrf.mxu1 }
 0x83e   : > { %2557 = vmatmul.msk.bf16.vlgmr.msrb.gmra.mxu1 %vm863_vm2, %v1709_v11 }
 0x841   : > { %v2788_v0 = vpop.eup %2787 }
 0x842   : > { %v1708_v17 = vmul.f32 %v2788_v0, %v2776_v39  ;;  %v1824_v18 = vpop.permute.xlu2 %1823 }
 0x843   : > { %v1829_v20 = vsel %vm939_vm5, %v1824_v18, 0 }
 0x844   : > { %v1710_v22 = vpack.c.bf16 %v1708_v17, %v1708_v17  ;;  %1838 = vmatpush.bf16.msra.mxu1 %v1829_v20  ;;  %v2008_v17 = vperm.slane %v3185_v3, 3 }
 0x846   : > { %2558 = vmatmul.msk.bf16.vlgmr.msrb.gmra.mxu2 %vm863_vm2, %v1710_v22 }
 0x84a   : > { %v1625_v23 = vpop.f32.mrf.mxu2 }
 0x852   : > { %v1627_v24 = vpop.f32.mrf.mxu2 }
 0x85d   : > { %v1813_v19 = vpop.xlane.xlu0 %1812 }
 0x85e   : > { %2789 = vrcp.f32 %v1813_v19 }
 0x864   : > { %v2790_v25 = vpop.eup %2789 }
 0x865   : > { %v1819_v26 = vmul.f32 %v2790_v25, %v2778_v49 }
 0x867   : > { %v1821_v27 = vpack.c.bf16 %v1819_v26, %v1819_v26 }
 0x869   : > { %v1816_v28 = vpop.xlane.xlu1 %1815  ;;  %2561 = vmatmul.msk.bf16.vlgmr.msra.gmra.mxu1 %vm863_vm2, %v1821_v27 }
 0x86a   : > { %2791 = vrcp.f32 %v1816_v28 }
 0x870   : > { %v2792_v30 = vpop.eup %2791  ;;  %v1957_v31 = vpop.permute.xlu0 %1956 }
 0x871   : > { %v1820_v60 = vmul.f32 %v2792_v30, %v2780_v61  ;;  %v1962_v10 = vsel %vm939_vm5, %v1957_v31, 0  ;;  %v1925_v32 = vpop.xlane.xlu1 %1924 }
 0x872   : > { %1971 = vmatpush.bf16.msrb.mxu2 %v1962_v10  ;;  %2793 = vrcp.f32 %v1925_v32  ;;  %v2638_v32 = vld [vmem:[%s2976_s26 + $0x8] sm:$0xff] }
 0x873   : > { %v1822_v56 = vpack.c.bf16 %v1820_v60, %v1820_v60  ;;  %2115 = vmatpush.bf16.msrb.mxu0 %v2638_v32 }
 0x875   : > { %2562 = vmatmul.msk.bf16.vlgmr.msra.gmra.mxu2 %vm863_vm2, %v1822_v56 }
 0x878   : > { %v2794_v33 = vpop.eup %2793 }
 0x879   : > { %v1931_v34 = vmul.f32 %v2794_v33, %v2782_v1 }
 0x87b   : > { %v1933_v36 = vpack.c.bf16 %v1931_v34, %v1931_v34 }
 0x889   : > { %v1936_v21 = vpop.permute.xlu1 %1935 }
 0x88a   : > { %v1941_v35 = vsel %vm939_vm5, %v1936_v21, 0 }
 0x88b   : > { %1950 = vmatpush.bf16.msrb.mxu1 %v1941_v35  ;;  %v2637_v35 = vld [vmem:[%s2976_s26] sm:$0xff] }
 0x88c   : > { %2116 = vmatpush.bf16.msrb.mxu0 %v2637_v35 }
 0x88e   : > { %2565 = vmatmul.msk.bf16.vlgmr.msrb.gmra.mxu1 %vm863_vm2, %v1933_v36  ;;  %v2646_v36 = vld [vmem:[%s2987_s14 + $0x38] sm:$0xff] }
 0x88f   : > { %2175 = vmatpush.bf16.msra.mxu1 %v2646_v36 }
 0x8aa   : > { %v1928_v29 = vpop.xlane.xlu2 %1927 }
 0x8ab   : > { %2795 = vrcp.f32 %v1928_v29 }
 0x8b1   : > { %v2796_v39 = vpop.eup %2795 }
 0x8b2   : > { %v1932_v40 = vmul.f32 %v2796_v39, %v2784_v12 }
 0x8b4   : > { %v1934_v41 = vpack.c.bf16 %v1932_v40, %v1932_v40  ;;  %v2645_v40 = vld [vmem:[%s2987_s14 + $0x30] sm:$0xff] }
 0x8b5   : > { %2176 = vmatpush.bf16.msra.mxu1 %v2645_v40 }
 0x8b6   : > { %2566 = vmatmul.msk.bf16.vlgmr.msrb.gmra.mxu2 %vm863_vm2, %v1934_v41 }
 0x8bb   : > { %v1728_v42 = vpop.f32.mrf.mxu1 }
 0x8c3   : > { %v1730_v43 = vpop.f32.mrf.mxu1 }
 0x8c9   : > { %v1749_v46 = vpop.f32.mrf.mxu2 }
 0x8ca   : > { %v2711_v47 = vpack.i.bf16 %v1749_v46, %v1728_v42  ;;  %v2644_v46 = vld [vmem:[%s2987_s14 + $0x28] sm:$0xff] }
 0x8cb   : > { %2177 = vmatpush.bf16.msra.mxu1 %v2644_v46 }
 0x8cc   : > { %2712 = vrot.lane.b32.xlu0 %v2711_v47, %s2842_s3 }
 0x8d1   : > { %v1751_v48 = vpop.f32.mrf.mxu2 }
 0x8e6   : > { %v1840_v49 = vpop.f32.mrf.mxu1 }
 0x8ee   : > { %v1842_v50 = vpop.f32.mrf.mxu1 }
 0x8f8   : > { %v1861_v51 = vpop.f32.mrf.mxu2 }
 0x8f9   : > { %v2716_v52 = vpack.i.bf16 %v1861_v51, %v1840_v49  ;;  %v2643_v49 = vld [vmem:[%s2987_s14 + $0x20] sm:$0xff] }
 0x8fa   : > { %2178 = vmatpush.bf16.msra.mxu1 %v2643_v49 }
 0x8fb   : > { %2717 = vrot.lane.b32.xlu2 %v2716_v52, %s2843_s20 }
 0x900   : > { %v1863_v53 = vpop.f32.mrf.mxu2 }
 0x90b   : > { %v1952_v55 = vpop.f32.mrf.mxu1 }
 0x913   : > { %v1954_v45 = vpop.f32.mrf.mxu1 }
 0x939   : > { %v1973_v58 = vpop.f32.mrf.mxu2 }
 0x93a   : > { %v2721_v5 = vpack.i.bf16 %v1973_v58, %v1952_v55 }
 0x93c   : > { %2722 = vrot.lane.b32.xlu0 %v2721_v5, %s2844_s4  ;;  %v2084_v5 = vperm.slane %v3185_v3, 4 }
 0x93e   : > { %v2713_v6 = vpop.permute.xlu0 %2712 }
 0x93f   : > { %v2715_v1 = vunpack.i.h.bf16 %v2713_v6  ;;  %v2714_v2 = vunpack.i.l.bf16 %v2713_v6 }
 0x941   : > { %v1975_v61 = vpop.f32.mrf.mxu2  ;;  %v2002_v8 = vsel %vm863_vm2, %v1625_v23, %v2715_v1  ;;  %v2001_v12 = vsel %vm863_vm2, %v3290_v9, %v2714_v2 }
 0x955   : > { %v2718_v63 = vpop.permute.xlu2 %2717 }
 0x956   : > { %v2720_v44 = vunpack.i.h.bf16 %v2718_v63  ;;  %v2719_v4 = vunpack.i.l.bf16 %v2718_v63  ;;  %v2087_v63 = vperm.slane %v3185_v3, 5  ;;  %v2726_v3 = vld [vmem:[%s718_s30] ss:$0 sm:$0xff] }
 0x958   : > { %v2003_v14 = vsel %vm1348_vm6, %v2001_v12, %v2719_v4  ;;  %v2004_v15 = vsel %vm1348_vm6, %v2002_v8, %v2720_v44  ;;  %v2642_v12 = vld [vmem:[%s2987_s14 + $0x18] sm:$0xff] }
 0x959   : > { %2179 = vmatpush.bf16.msra.mxu1 %v2642_v12 }
 0x9ae   : > { %v2723_v7 = vpop.permute.xlu0 %2722 }
 0x9af   : > { %v2725_v13 = vunpack.i.h.bf16 %v2723_v7  ;;  %v2724_v54 = vunpack.i.l.bf16 %v2723_v7 }
 0x9b1   : > { %v2005_v11 = vsel %vm1351_vm7, %v2003_v14, %v2724_v54  ;;  %v2006_v16 = vsel %vm1351_vm7, %v2004_v15, %v2725_v13  ;;  %v2641_v13 = vld [vmem:[%s2987_s14 + $0x10] sm:$0xff]  ;;  %v2640_v54 = vld [vmem:[%s2987_s14 + $0x8] sm:$0xff]  ;;  %v2639_v14 = vld [vmem:[%s2987_s14] sm:$0xff]  ;;  %s3407_s14 = sld [smem:[#allocation13_spill]] (!%p2617_p6) }
 0x9b2   : > { %v2007_v0 = vpack.c.bf16 %v2006_v16, %v2005_v11  ;;  %2180 = vmatpush.bf16.msra.mxu1 %v2641_v13 }
 0x9b4   : > { %2575 = vmatmul.msk.bf16.vlgmr.msrb.gmra.mxu3 %vm817_vm1, %v2007_v0 }
 0x9b6   : > { %2181 = vmatpush.bf16.msra.mxu1 %v2640_v54 }
 0x9ba   : > { %2182 = vmatpush.bf16.msra.mxu1 %v2639_v14 }
 0xa37   : > { %v2033_v18 = vpop.f32.mrf.mxu3 }
 0xa38   : > { %v2034_v20 = vadd.f32 %v2033_v18, %v2008_v17 }
 0xa3a   : > { %v2038_v22 = vadd.f32 %v2034_v20, %v3173_v37 }
 0xa3c   : > { %v2040_v9 = vsel %vm817_vm1, %v2038_v22, 0.0 }
 0xa3d   : > { %2041 = vadd.xlane.f32.xlu1 %v2040_v9 }
 0xa3f   : > { %v2035_v23 = vpop.f32.mrf.mxu3 }
 0xa40   : > { %v2036_v24 = vadd.f32 %v2035_v23, %v2008_v17 }
 0xa42   : > { %v2039_v19 = vadd.f32 %v2036_v24, %v3175_v38 }
 0xa44   : > { %v2043_v25 = vsel %vm817_vm1, %v2039_v19, 0.0 }
 0xa45   : > { %2044 = vadd.xlane.f32.xlu0 %v2043_v25 }
 0xab0   : > { %v2042_v26 = vpop.xlane.xlu1 %2041 }
 0xab1   : > { %v2046_v27 = vmul.f32 %v2042_v26, %v3160_v59 }
 0xab3   : > { %v2048_v28 = vsub.f32 %v2038_v22, %v2046_v27  ;;  %v803_v22 = vld [vmem:[%s2992_s19] sm:$0x7] }
 0xab4   : > { %v2126_v9 = vperm.slane %v803_v22, 0 }
 0xab5   : > { %v2050_v30 = vmul.f32 %v2048_v28, %v2048_v28 }
 0xab7   : > { %v2052_v31 = vsel %vm817_vm1, %v2050_v30, 0.0 }
 0xab8   : > { %v2045_v37 = vpop.xlane.xlu0 %2044  ;;  %2053 = vadd.xlane.f32.xlu2 %v2052_v31 }
 0xab9   : > { %v2047_v60 = vmul.f32 %v2045_v37, %v3160_v59 }
 0xabb   : > { %v2049_v10 = vsub.f32 %v2039_v19, %v2047_v60 }
 0xabd   : > { %v2051_v56 = vmul.f32 %v2049_v10, %v2049_v10 }
 0xabf   : > { %v2055_v38 = vsel %vm817_vm1, %v2051_v56, 0.0 }
 0xac0   : > { %2056 = vadd.xlane.f32.xlu1 %v2055_v38 }
 0xb2b   : > { %v2054_v33 = vpop.xlane.xlu2 %2053 }
 0xb2c   : > { %v2058_v34 = vmul.f32 %v2054_v33, %v3160_v59 }
 0xb2e   : > { %v2060_v21 = vadd.f32 1e-05, %v2058_v34 }
 0xb30   : > { %2797 = vrsqrt.f32 %v2060_v21  ;;  %vm2068_vm3 = vweird.f32 %v2060_v21 }
 0xb33   : > { %v2057_v29 = vpop.xlane.xlu1 %2056 }
 0xb34   : > { %v2059_v39 = vmul.f32 %v2057_v29, %v3160_v59 }
 0xb36   : > { %v2798_v41 = vpop.eup %2797  ;;  %v2061_v42 = vadd.f32 1e-05, %v2059_v39 }
 0xb37   : > { %v2063_v43 = vmul.f32 %v2798_v41, %v2060_v21  ;;  %vm2069_vm2 = vweird.f32 %v2798_v41 }
 0xb38   : > { %2799 = vrsqrt.f32 %v2061_v42  ;;  %vm2070_vm4 = vmor %vm2068_vm3, %vm2069_vm2  ;;  %vm2078_vm6 = vweird.f32 %v2061_v42 }
 0xb39   : > { %v2064_v47 = vmul.f32 %v2798_v41, %v2063_v43 }
 0xb3b   : > { %v2065_v48 = vmul.f32 0.5, %v2064_v47 }
 0xb3d   : > { %v2066_v50 = vsub.f32 1.5, %v2065_v48 }
 0xb3e   : > { %v2800_v51 = vpop.eup %2799 }
 0xb3f   : > { %v2067_v52 = vmul.f32 %v2798_v41, %v2066_v50  ;;  %v2073_v53 = vmul.f32 %v2800_v51, %v2061_v42  ;;  %vm2079_vm5 = vweird.f32 %v2800_v51 }
 0xb40   : > { %vm2080_vm7 = vmor %vm2078_vm6, %vm2079_vm5 }
 0xb41   : > { %v2074_v55 = vmul.f32 %v2800_v51, %v2073_v53  ;;  %v2071_v45 = vsel %vm2070_vm4, %v2798_v41, %v2067_v52  ;;  %v2235_v52 = vperm.slane %v803_v22, 1 }
 0xb42   : > { %v2082_v61 = vmul.f32 %v2071_v45, %v2048_v28  ;;  %v2238_v45 = vperm.slane %v803_v22, 2 }
 0xb43   : > { %v2075_v57 = vmul.f32 0.5, %v2074_v55 }
 0xb44   : > { %v2085_v1 = vmul.f32 %v2084_v5, %v2082_v61 }
 0xb45   : > { %v2076_v58 = vsub.f32 1.5, %v2075_v57 }
 0xb46   : > { %v2088_v4 = vadd.f32 %v2087_v63, %v2085_v1 }
 0xb47   : > { %v2077_v62 = vmul.f32 %v2800_v51, %v2076_v58 }
 0xb49   : > { %v2081_v6 = vsel %vm2080_vm7, %v2800_v51, %v2077_v62 }
 0xb4a   : > { %v2083_v2 = vmul.f32 %v2081_v6, %v2049_v10 }
 0xb4c   : > { %v2086_v44 = vmul.f32 %v2084_v5, %v2083_v2 }
 0xb4e   : > { %v2089_v7 = vadd.f32 %v2087_v63, %v2086_v44 }
 0xb50   : > { %v2090_v8 = vpack.c.bf16 %v2089_v7, %v2088_v4 }
 0xb52   : > { %2584 = vmatmul.msk.bf16.vlgmr.msrb.gmra.mxu0 %vm817_vm1, %v2090_v8 }
 0xbcf   : > { %v2118_v15 = vpop.f32.mrf.mxu0 }
 0xbd0   : > { %v2119_v11 = vadd.f32 %v2726_v3, %v2118_v15 }
 0xbd2   : > { %v2123_v17 = vmax.f32 %v2119_v11, 0.0 }
 0xbd7   : > { %v2120_v16 = vpop.f32.mrf.mxu0 }
 0xbd8   : > { %v2121_v0 = vadd.f32 %v2726_v3, %v2120_v16 }
 0xbda   : > { %v2124_v18 = vmax.f32 %v2121_v0, 0.0 }
 0xbdc   : > { %v2125_v20 = vpack.c.bf16 %v2124_v18, %v2123_v17 }
 0xbde   : > { %2183 = vmatmul.bf16.vlgmr.msra.gmra.mxu1 %v2125_v20 }
 0xc5b   : > { %v2184_v23 = vpop.f32.mrf.mxu1 }
 0xc5c   : > { %v2185_v24 = vadd.f32 %v2184_v23, %v2126_v9 }
 0xc5e   : > { %v2189_v19 = vadd.f32 %v2185_v24, %v2088_v4 }
 0xc60   : > { %v2191_v25 = vsel %vm817_vm1, %v2189_v19, 0.0 }
 0xc61   : > { %2192 = vadd.xlane.f32.xlu0 %v2191_v25 }
 0xc63   : > { %v2186_v26 = vpop.f32.mrf.mxu1 }
 0xc64   : > { %v2187_v27 = vadd.f32 %v2186_v26, %v2126_v9 }
 0xc66   : > { %v2190_v28 = vadd.f32 %v2187_v27, %v2089_v7 }
 0xc68   : > { %v2194_v30 = vsel %vm817_vm1, %v2190_v28, 0.0 }
 0xc69   : > { %2195 = vadd.xlane.f32.xlu1 %v2194_v30 }
 0xcd4   : > { %v2193_v31 = vpop.xlane.xlu0 %2192 }
 0xcd5   : > { %v2197_v37 = vmul.f32 %v2193_v31, %v3160_v59 }
 0xcd7   : > { %v2199_v60 = vsub.f32 %v2189_v19, %v2197_v37 }
 0xcd9   : > { %v2201_v10 = vmul.f32 %v2199_v60, %v2199_v60 }
 0xcdb   : > { %v2203_v56 = vsel %vm817_vm1, %v2201_v10, 0.0 }
 0xcdc   : > { %v2196_v38 = vpop.xlane.xlu1 %2195  ;;  %2204 = vadd.xlane.f32.xlu0 %v2203_v56 }
 0xcdd   : > { %v2198_v32 = vmul.f32 %v2196_v38, %v3160_v59 }
 0xcdf   : > { %v2200_v33 = vsub.f32 %v2190_v28, %v2198_v32 }
 0xce1   : > { %v2202_v34 = vmul.f32 %v2200_v33, %v2200_v33 }
 0xce3   : > { %v2206_v21 = vsel %vm817_vm1, %v2202_v34, 0.0 }
 0xce4   : > { %2207 = vadd.xlane.f32.xlu1 %v2206_v21 }
 0xd4f   : > { %v2205_v35 = vpop.xlane.xlu0 %2204 }
 0xd50   : > { %v2209_v36 = vmul.f32 %v2205_v35, %v3160_v59 }
 0xd52   : > { %v2211_v29 = vadd.f32 1e-05, %v2209_v36 }
 0xd54   : > { %2801 = vrsqrt.f32 %v2211_v29  ;;  %vm2219_vm9 = vweird.f32 %v2211_v29 }
 0xd57   : > { %v2208_v39 = vpop.xlane.xlu1 %2207 }
 0xd58   : > { %v2210_v40 = vmul.f32 %v2208_v39, %v3160_v59 }
 0xd5a   : > { %v2802_v41 = vpop.eup %2801  ;;  %v2212_v42 = vadd.f32 1e-05, %v2210_v40 }
 0xd5b   : > { %v2214_v43 = vmul.f32 %v2802_v41, %v2211_v29  ;;  %vm2220_vm8 = vweird.f32 %v2802_v41 }
 0xd5c   : > { %2803 = vrsqrt.f32 %v2212_v42  ;;  %vm2221_vm10 = vmor %vm2219_vm9, %vm2220_vm8  ;;  %vm2229_vm12 = vweird.f32 %v2212_v42 }
 0xd5d   : > { %v2215_v46 = vmul.f32 %v2802_v41, %v2214_v43 }
 0xd5f   : > { %v2216_v47 = vmul.f32 0.5, %v2215_v46 }
 0xd61   : > { %v2217_v48 = vsub.f32 1.5, %v2216_v47 }
 0xd62   : > { %v2804_v49 = vpop.eup %2803 }
 0xd63   : > { %v2218_v50 = vmul.f32 %v2802_v41, %v2217_v48  ;;  %v2224_v51 = vmul.f32 %v2804_v49, %v2212_v42  ;;  %vm2230_vm11 = vweird.f32 %v2804_v49 }
 0xd64   : > { %vm2231_vm13 = vmor %vm2229_vm12, %vm2230_vm11 }
 0xd65   : > { %v2222_v53 = vsel %vm2221_vm10, %v2802_v41, %v2218_v50  ;;  %v2225_v55 = vmul.f32 %v2804_v49, %v2224_v51 }
 0xd66   : > { %v2233_v57 = vmul.f32 %v2222_v53, %v2199_v60 }
 0xd67   : > { %v2226_v58 = vmul.f32 0.5, %v2225_v55 }
 0xd68   : > { %v2236_v59 = vmul.f32 %v2235_v52, %v2233_v57 }
 0xd69   : > { %v2227_v5 = vsub.f32 1.5, %v2226_v58 }
 0xd6a   : > { %v2239_v61 = vadd.f32 %v2238_v45, %v2236_v59 }
 0xd6b   : > { %v2228_v62 = vmul.f32 %v2804_v49, %v2227_v5 }
 0xd6c   : > { %2241 = vst.msk [vmem:[#allocation2] sm:$0xff] %vm817_vm1, %v2239_v61 }
 0xd6d   : > { %v2232_v6 = vsel %vm2231_vm13, %v2804_v49, %v2228_v62 }
 0xd6e   : > { %v2234_v63 = vmul.f32 %v2232_v6, %v2200_v33 }
 0xd70   : > { %v2237_v1 = vmul.f32 %v2235_v52, %v2234_v63  ;;  %2246 = sbr.rel (%p2617_p6) target bundleno = 3449 (0xd79), region = 84 }
 0xd72   : > { %v2240_v2 = vadd.f32 %v2238_v45, %v2237_v1 }
 0xd74   : > { %2242 = vst.msk [vmem:[#allocation2 + $0x8] sm:$0xff] %vm817_vm1, %v2240_v2 }
 0xd75   : > { %v2247_v44 = vpack.c.bf16 %v2239_v61, %v2239_v61  ;;  %vm2249_vm14 = vcmask 257024   ;;  %v2248_v4 = vpack.c.bf16 %v2240_v2, %v2240_v2 }
 0xd77   : > { %2250 = vst.msk [vmem:[%s3407_s14] sm:$0xf] %vm2249_vm14, %v2247_v44 }
 0xd78   : > { %2251 = vst.msk [vmem:[%s3407_s14 + $0x4] sm:$0xf] %vm2249_vm14, %v2248_v4 }
 0xd79 PF: > { %s3408_s7 = sld [smem:[#allocation4_spill]] }
 0xd7a   : > { %s3409_s29 = sld [smem:[#allocation3_spill]] }
 0xd7b   : > { %s3410_s30 = sld [smem:[#allocation5_spill]] }
 0xd7f   : > { %s24_s15 = sadd.s32 1, %s3408_s7  }
 0xd80   : > { %p21_p7 = scmp.ge.s32.totalorder %s24_s15, 4  }
 0xd82   :  { %23 = sbr.rel (!%p21_p7) target bundleno = 9 (0x9), region = 153 }

</bundles_post_ra>
